<compile_context>
chip_gen: v7x
topology: tpu7x:2x2x1
jax: 0.10.0
libtpu: 0.0.40
codegen_flags: <defaults>
</compile_context>

<pallas_src>
import math

import jax
import jax.numpy as jnp
import numpy as np
from jax import lax
from jax.experimental import pallas as pl
from jax.experimental.pallas import tpu as pltpu

# ----------------------------- config (MambaConfig) -----------------------------
D_MODEL = 8
N_LAYERS = 1
D_STATE = 16
EXPAND = 2
D_CONV = 4
D_INNER = EXPAND * D_MODEL            # 16
DT_RANK = math.ceil(D_MODEL / 16)     # 1
EPS = 1e-5                            # RMSNorm eps

assert D_INNER == D_STATE, "required by torch matmul broadcasting in selective_scan"

# pack16 lane offsets (all segments have d_inner = 16 rows); W == D_STATE here.
_SEG_AREP = 0                                        # A[i, s] repeated over w      (256)
_SEG_RPOS = _SEG_AREP + D_STATE * D_STATE            # lane-tiling matrix           (256)
_SEG_RGRP = _SEG_RPOS + D_STATE * D_STATE            # lane-group selection matrix  (256)
_SEG_WOREP = _SEG_RGRP + D_STATE * D_STATE           # Wo[c, i] per lane group c    (128)
_SEG_WOREPD = _SEG_WOREP + D_MODEL * D_STATE         # Wo[c, i] * D[b]              (128)
_SEG_RPOS8 = _SEG_WOREPD + D_MODEL * D_STATE         # 8-group lane tiling matrix   (128)
_SEG_SMALL = _SEG_RPOS8 + D_MODEL * D_STATE          # [conv1d_w | conv1d_b | dt_b] (6)
P16_WIDTH = _SEG_SMALL + D_CONV + 2                  # 1158


# ------------------------------ small math helpers ------------------------------
def _silu(v):
    # sigmoid denominator via pl.reciprocal (EUP) instead of a VALU divide sequence
    return v * pl.reciprocal(1.0 + jnp.exp(-v))


def _softplus(v):
    # stable softplus from basic ops (lowers cleanly in Mosaic)
    return jnp.maximum(v, 0.0) + jnp.log(1.0 + jnp.exp(-jnp.abs(v)))


# ----------------------------------- kernel -------------------------------------
def mamba_block_kernel(x_ref, xrow_ref, p16_ref, p32_ref, wbig_ref, out_ref):
    """One grid step == one batch element."""
    f32 = jnp.float32
    L = xrow_ref.shape[1]
    C = D_MODEL
    W = D_STATE
    DI = D_INNER
    DS = D_STATE

    # ---- hoisted, loop-invariant weight loads ----
    a_rep = p16_ref[:, _SEG_AREP:_SEG_AREP + DS * W]          # (DI, DS*W)  A[i,s]
    r_pos = p16_ref[:, _SEG_RPOS:_SEG_RPOS + DS * W]          # (W,  DS*W)  1 at (w'==w)
    r_grp = p16_ref[:, _SEG_RGRP:_SEG_RGRP + DS * W]          # (DS, DS*W)  1 at (j==s)
    wo_rep = p16_ref[:, _SEG_WOREP:_SEG_WOREP + C * W]        # (DI, C*W)   Wo[c,i]
    wo_repD = p16_ref[:, _SEG_WOREPD:_SEG_WOREPD + C * W]     # (DI, C*W)   Wo[c,i]*D[b]
    r_pos8 = p16_ref[:, _SEG_RPOS8:_SEG_RPOS8 + C * W]        # (W,  C*W)   1 at (w'==b)
    small = p16_ref[:, _SEG_SMALL:_SEG_SMALL + D_CONV + 2]    # (DI, d_conv+2)
    wc = small[:, :D_CONV]                                    # (DI, d_conv)
    bc = small[:, D_CONV:D_CONV + 1]                          # (DI, 1)
    bd = small[:, D_CONV + 1:D_CONV + 2]                      # (DI, 1)

    p32 = p32_ref[...]
    wcat = p32[:, :3 * C]                                     # (2*DI, 3*C)  in_proj taps
    g_all = p32[:, 3 * C:3 * C + 1]                           # (L*C, 1)     RMSNorm weight
    w_big = wbig_ref[...]                                     # (DI + 2*DS, DI)

    # ---- phase 1: RMSNorm (one pass on the whole (L*C, W) slab) + in_proj ----
    xs = x_ref[0]                                             # (L*C, W)
    ms = jnp.mean(xs * xs, axis=-1, keepdims=True)            # torch mean(-1)
    u = xs * lax.rsqrt(ms + EPS) * g_all
    zcol = jnp.zeros((L * C, 1), f32)
    u_m1 = jnp.concatenate([zcol, u[:, :W - 1]], axis=1)      # u[:, w-1] (zero padded)
    u_p1 = jnp.concatenate([u[:, 1:], zcol], axis=1)          # u[:, w+1] (zero padded)
    # Conv3d 1x3x3 with H == 1: only the centre kh tap touches real data; fold the
    # three W-taps into one K=24 matmul per time step, concat results lane-wise.
    xz_parts = []
    for l in range(L):
        rows = slice(l * C, (l + 1) * C)
        u_l = jnp.concatenate([u_m1[rows], u[rows], u_p1[rows]], axis=0)   # (3*C, W)
        xz_parts.append(jnp.dot(wcat, u_l, preferred_element_type=f32))   # (2*DI, W)
    xz = jnp.concatenate(xz_parts, axis=1)                    # (2*DI, L*W), lane = l*W+w
    x1_t = xz[:DI, :]                                         # (DI, L*W)
    z_t = xz[DI:, :]                                          # (DI, L*W)

    # ---- phase 2: depthwise causal conv over L (lane shifts by W) + bias + SiLU ----
    acc = bc + wc[:, D_CONV - 1:D_CONV] * x1_t
    for k in range(D_CONV - 1):
        shift = (D_CONV - 1 - k) * W
        shifted = jnp.concatenate(
            [jnp.zeros((DI, shift), f32), x1_t[:, :L * W - shift]], axis=1)
        acc = acc + wc[:, k:k + 1] * shifted
    x2_t = _silu(acc)                                         # (DI, L*W)
    sz_t = _silu(z_t)                                         # (DI, L*W)

    # ---- phase 3a: x_proj + dt_proj for all time steps in ONE matmul ----
    dbc = jnp.dot(w_big, x2_t, preferred_element_type=f32)    # (DI+2*DS, L*W)
    delta_all = _softplus(dbc[:DI, :] + bd)                   # (DI, L*W)
    bm_all = dbc[DI:DI + DS, :]                               # (DS, L*W)
    cm_all = dbc[DI + DS:DI + 2 * DS, :]                      # (DS, L*W)

    # ---- phase 3b: selective scan with a single lane-packed state carry ----
    # TODO(synk): `pscan` is referenced but never defined in the source file; this is the
    # standard first-order recurrence h_t = deltaA_t * h_{t-1} + BX_t (matches step()).
    # State layout: h[i, s*W + w] == hs[n, i, l, 0, w, s].
    h = jnp.zeros((DI, DS * W), f32)
    for l in range(L):
        cols = slice(l * W, (l + 1) * W)
        delta_l = delta_all[:, cols]                          # (DI, W)
        x2_l = x2_t[:, cols]
        sz_l = sz_t[:, cols]
        bm_l = bm_all[:, cols]
        cm_l = cm_all[:, cols]

        # lane-tile (i, w) -> (i, s*W + w) with exact 0/1 selection matmuls (MXU is idle)
        delta_f = jnp.dot(delta_l, r_pos, preferred_element_type=f32)     # (DI, DS*W)
        x2_f = jnp.dot(x2_l, r_pos, preferred_element_type=f32)
        # Bm[s, w] flattened into one (1, DS*W) row: block-diag select + sublane reduce
        bm_row = jnp.sum(jnp.dot(bm_l, r_pos, preferred_element_type=f32) * r_grp,
                         axis=0, keepdims=True)                            # (1, DS*W)

        # one exp + a handful of 256-lane elementwise ops per time step
        h = jnp.exp(delta_f * a_rep) * h + delta_f * x2_f * bm_row

        # y[i, a] = sum_s h[i, s*W+a] * Cm[i, s], computed directly transposed as (a, i)
        cm_rep = jnp.dot(cm_l, r_grp, preferred_element_type=f32)          # (DI, DS*W)
        y_t = lax.dot_general(r_pos, h * cm_rep, (((1,), (1,)), ((), ())),
                              preferred_element_type=f32)                  # (W_a, DI)

        # ---- out_proj + gated D*x term + residual: one lane-dense (W, C*W) slab ----
        sz8 = jnp.dot(sz_l, r_pos8, preferred_element_type=f32)            # (DI, C*W)
        x28 = jnp.dot(x2_l, r_pos8, preferred_element_type=f32)            # (DI, C*W)
        m_gate = wo_rep * sz8                                              # Wo[c,i]*silu(z)[i,b]
        term1 = jnp.dot(y_t, m_gate, preferred_element_type=f32)           # (W_a, C*W)
        # D broadcasts over the W axis (torch broadcasting), made explicit via wo_repD.
        term2 = jnp.sum(wo_repD * sz8 * x28, axis=0, keepdims=True)        # (1, C*W)
        out_ref[0, l] = term1 + term2 + xrow_ref[0, l]                     # unmasked 128-lane store


# -------------------------------- JAX wrapper ------------------------------------
def mamba_forward(x, params):
    """x: (N, d_model, L, 1, W) float32 (torch NCDHW).  Returns (N, d_model, 1, W, W)."""
    N, C, L, H, W = x.shape
    assert H == 1 and W == D_STATE == D_INNER and C == D_MODEL and DT_RANK == 1
    f32 = jnp.float32

    # activations in two layouts: (l*c) rows x W lanes for compute, and a lane-dense
    # (1, C*W) row per (n, l) for the ResidualBlock residual.
    x_nlcw = jnp.transpose(x[:, :, :, 0, :], (0, 2, 1, 3)).astype(f32)   # (N, L, C, W)
    x_rows = x_nlcw.reshape(N, L * C, W)
    x_res = x_nlcw.reshape(N, L, 1, C * W)

    # --- parameter plumbing (glue, plain JAX) ---
    g = params['rms_w'].astype(f32)
    g_all = jnp.tile(g.reshape(1, C), (L, 1)).reshape(L * C, 1)
    wi = params['in_proj_w'][:, :, 0, 1, :].astype(f32)        # centre kh tap (H == 1)
    wcat = jnp.concatenate([wi[:, :, 0], wi[:, :, 1], wi[:, :, 2]], axis=1)   # (2*DI, 3*C)
    pack32 = jnp.concatenate([wcat, g_all], axis=1)            # (2*DI, 3*C + 1)

    wc = params['conv1d_w'][:, 0, :, 0, 0].astype(f32)         # (DI, d_conv)
    bc = params['conv1d_b'].reshape(D_INNER, 1).astype(f32)
    wx = params['x_proj_w'][:, :, 0, 0, 0].astype(f32)         # (dt_rank + 2*d_state, DI)
    wd = params['dt_proj_w'][:, :, 0, 0, 0].astype(f32)        # (DI, dt_rank)
    bd = params['dt_proj_b'].reshape(D_INNER, 1).astype(f32)
    w_delta = wd @ wx[:DT_RANK]                                # dt_proj o x_proj_dt  (DI, DI)
    w_big = jnp.concatenate(
        [w_delta, wx[DT_RANK:DT_RANK + D_STATE], wx[DT_RANK + D_STATE:]], axis=0)

    A = -jnp.exp(params['A_log'].astype(f32))                  # (DI, DS)
    a_rep = jnp.repeat(A, W, axis=1)                           # A[i, s] at lane s*W+w
    eye_w = jnp.eye(W, dtype=f32)
    r_pos = jnp.tile(eye_w, (1, D_STATE))                      # 1 at (w' == w)
    r_grp = jnp.repeat(jnp.eye(D_STATE, dtype=f32), W, axis=1) # 1 at (j == s)
    r_pos8 = jnp.tile(eye_w, (1, C))                           # 1 at (w' == b)
    wo = params['out_proj_w'][:, :, 0, 0, 0].astype(f32)       # (d_model, d_inner)
    wo_rep = jnp.repeat(wo.T, W, axis=1)                       # Wo[c, i] at lane c*W+b
    # D broadcasts over the W axis in the reference (torch broadcasting) -- explicit here.
    d_tiled = jnp.tile(params['D'].astype(f32), C).reshape(1, C * W)
    wo_repD = wo_rep * d_tiled

    pack16 = jnp.concatenate(
        [a_rep, r_pos, r_grp, wo_rep, wo_repD, r_pos8, wc, bc, bd], axis=1)
    assert pack16.shape == (D_INNER, P16_WIDTH)

    out = pl.pallas_call(
        mamba_block_kernel,
        out_shape=jax.ShapeDtypeStruct((N, L, W, C * W), f32),
        grid=(N,),
        in_specs=[
            pl.BlockSpec((1, L * C, W), lambda n: (n, 0, 0)),
            pl.BlockSpec((1, L, 1, C * W), lambda n: (n, 0, 0, 0)),
            pl.BlockSpec(pack16.shape, lambda n: (0, 0)),
            pl.BlockSpec(pack32.shape, lambda n: (0, 0)),
            pl.BlockSpec(w_big.shape, lambda n: (0, 0)),
        ],
        out_specs=pl.BlockSpec((1, L, W, C * W), lambda n: (n, 0, 0, 0)),
        compiler_params=pltpu.CompilerParams(dimension_semantics=("parallel",)),
    )(x_rows, x_res, pack16, pack32, w_big)

    # (N, L, A, C*W) -> torch ResidualBlock output (N, C, L, A, B), then Mamba: x[:, :, [0]].
    res = jnp.transpose(out.reshape(N, L, W, C, W), (0, 3, 1, 2, 4))
    return res[:, :, 0:1]


# ---------------------- deterministic parameter initialization -------------------
def make_params(key):
    ks = jax.random.split(key, 7)
    p = {}
    p['rms_w'] = jnp.ones((D_MODEL,), jnp.float32)                     # RMSNorm weight (ones)
    p['in_proj_w'] = 0.15 * jax.random.normal(ks[0], (2 * D_INNER, D_MODEL, 1, 3, 3), jnp.float32)
    p['conv1d_w'] = 0.30 * jax.random.normal(ks[1], (D_INNER, 1, D_CONV, 1, 1), jnp.float32)
    p['conv1d_b'] = 0.05 * jax.random.normal(ks[2], (D_INNER,), jnp.float32)
    p['x_proj_w'] = (D_INNER ** -0.5) * jax.random.normal(
        ks[3], (DT_RANK + 2 * D_STATE, D_INNER, 1, 1, 1), jnp.float32)
    dt_init_std = DT_RANK ** -0.5
    p['dt_proj_w'] = jax.random.uniform(ks[4], (D_INNER, DT_RANK, 1, 1, 1), jnp.float32,
                                        minval=-dt_init_std, maxval=dt_init_std)
    u = jax.random.uniform(ks[5], (D_INNER,), jnp.float32)
    dt = jnp.exp(u * (math.log(0.1) - math.log(0.001)) + math.log(0.001))
    dt = jnp.maximum(dt, 1e-4)
    p['dt_proj_b'] = dt + jnp.log(-jnp.expm1(-dt))                     # inv_dt init
    p['A_log'] = jnp.log(jnp.tile(jnp.arange(1, D_STATE + 1, dtype=jnp.float32)[None, :],
                                  (D_INNER, 1)))
    p['D'] = jnp.ones((D_INNER,), jnp.float32)
    p['out_proj_w'] = (D_INNER ** -0.5) * jax.random.normal(ks[6], (D_MODEL, D_INNER, 1, 1, 1),
                                                            jnp.float32)
    # TODO(synk): spatial_kernel_A / spatial_bias_A (and msconv) are only used in the
    # pscan=False selective_scan_seq path, which the default forward never executes.
    return p


# ----------------------- pure-JAX reference (torch semantics) --------------------
def reference_forward(x, p):
    N, C, L, H, W = x.shape
    hi = lax.Precision.HIGHEST
    dn = ('NCDHW', 'OIDHW', 'NCDHW')
    u = x * lax.rsqrt(jnp.mean(x * x, axis=-1, keepdims=True) + EPS) \
        * p['rms_w'].reshape(1, C, 1, 1, 1)
    xz = lax.conv_general_dilated(u, p['in_proj_w'], (1, 1, 1),
                                  ((0, 0), (1, 1), (1, 1)), dimension_numbers=dn, precision=hi)
    x1, z = xz[:, :D_INNER], xz[:, D_INNER:]
    xc = lax.conv_general_dilated(x1, p['conv1d_w'], (1, 1, 1),
                                  ((D_CONV - 1, D_CONV - 1), (0, 0), (0, 0)),
                                  dimension_numbers=dn, feature_group_count=D_INNER, precision=hi)
    xc = xc + p['conv1d_b'].reshape(1, -1, 1, 1, 1)
    x2 = jax.nn.silu(xc[:, :, :L])
    dBC = jnp.einsum('oc,nclhw->nolhw', p['x_proj_w'][:, :, 0, 0, 0], x2, precision=hi)
    dr = dBC[:, :DT_RANK]
    B = dBC[:, DT_RANK:DT_RANK + D_STATE]
    Cmat = dBC[:, DT_RANK + D_STATE:]
    delta = jax.nn.softplus(jnp.einsum('oc,nclhw->nolhw', p['dt_proj_w'][:, :, 0, 0, 0],
                                       dr, precision=hi)
                            + p['dt_proj_b'].reshape(1, -1, 1, 1, 1))
    A = -jnp.exp(p['A_log'])
    deltaA = jnp.exp(delta[..., None] * A[None, :, None, None, None, :])
    deltaB = delta[..., None] * jnp.transpose(B[:, None], (0, 1, 3, 4, 5, 2))
    BX = deltaB * x2[..., None]
    h = jnp.zeros_like(BX[:, :, 0])
    hs = []
    for t in range(L):
        h = deltaA[:, :, t] * h + BX[:, :, t]
        hs.append(h)
    hs = jnp.stack(hs, axis=2)
    y = jnp.matmul(hs, Cmat[..., None])            # torch broadcasting matmul
    y = jnp.squeeze(y, axis=3)                     # torch .squeeze(3)  (H == 1)
    y = y + p['D'] * x2
    out = y * jax.nn.silu(z)
    out = jnp.einsum('oc,ncl...->nol...', p['out_proj_w'][:, :, 0, 0, 0], out, precision=hi)
    res = out + x                                  # ResidualBlock residual
    return res[:, :, 0:1]                          # Mamba: x[:, :, [0]]


# ------------------------------------- main --------------------------------------
if __name__ == "__main__":
    key = jax.random.PRNGKey(0)
    kx, kp = jax.random.split(key)
    N, L, H, W = 2, 4, 1, 16
    x = jax.random.normal(kx, (N, D_MODEL, L, H, W), jnp.float32)
    params = make_params(kp)

    out = jax.jit(mamba_forward)(x, params)
    out = jax.block_until_ready(out)
    assert out.shape == (N, D_MODEL, 1, W, W)

    ref = reference_forward(x, params)
    np.testing.assert_allclose(np.asarray(out), np.asarray(ref), rtol=1e-2, atol=1e-2)

    print("KERNEL_OK")
</pallas_src>

<mosaic_0001>
module attributes {stable_mosaic.version = 11 : i64} {
  func.func @mamba_block_kernel(%arg0: i32, %arg1: memref<1x32x16xf32, #tpu.memory_space<vmem>>, %arg2: memref<1x4x1x128xf32, #tpu.memory_space<vmem>>, %arg3: memref<16x1158xf32, #tpu.memory_space<vmem>>, %arg4: memref<32x25xf32, #tpu.memory_space<vmem>>, %arg5: memref<48x16xf32, #tpu.memory_space<vmem>>, %arg6: memref<1x4x16x128xf32, #tpu.memory_space<vmem>>) attributes {dimension_semantics = [#tpu.dimension_semantics<parallel>], iteration_bounds = array<i64: 2>, scalar_prefetch = 0 : i64, scratch_operands = 0 : i64, tpu.core_type = #tpu.core_type<tc>, window_params = [{transform_indices = @transform_0, window_bounds = array<i64: 1, 32, 16>}, {transform_indices = @transform_1, window_bounds = array<i64: 1, 4, 1, 128>}, {pipeline_mode = #tpu.pipeline_mode<synchronous>, transform_indices = @transform_2, window_bounds = array<i64: 16, 1158>}, {pipeline_mode = #tpu.pipeline_mode<synchronous>, transform_indices = @transform_3, window_bounds = array<i64: 32, 25>}, {pipeline_mode = #tpu.pipeline_mode<synchronous>, transform_indices = @transform_4, window_bounds = array<i64: 48, 16>}, {transform_indices = @transform_5, window_bounds = array<i64: 1, 4, 16, 128>}]} {
    %c0 = arith.constant 0 : index
    %c0_0 = arith.constant 0 : index
    %0 = vector.load %arg3[%c0, %c0_0] : memref<16x1158xf32, #tpu.memory_space<vmem>>, vector<16x256xf32>
    %c0_1 = arith.constant 0 : index
    %c256 = arith.constant 256 : index
    %1 = vector.load %arg3[%c0_1, %c256] : memref<16x1158xf32, #tpu.memory_space<vmem>>, vector<16x256xf32>
    %c0_2 = arith.constant 0 : index
    %c512 = arith.constant 512 : index
    %2 = vector.load %arg3[%c0_2, %c512] : memref<16x1158xf32, #tpu.memory_space<vmem>>, vector<16x256xf32>
    %c0_3 = arith.constant 0 : index
    %c768 = arith.constant 768 : index
    %3 = vector.load %arg3[%c0_3, %c768] : memref<16x1158xf32, #tpu.memory_space<vmem>>, vector<16x128xf32>
    %c0_4 = arith.constant 0 : index
    %c896 = arith.constant 896 : index
    %4 = vector.load %arg3[%c0_4, %c896] : memref<16x1158xf32, #tpu.memory_space<vmem>>, vector<16x128xf32>
    %c0_5 = arith.constant 0 : index
    %c1024 = arith.constant 1024 : index
    %5 = vector.load %arg3[%c0_5, %c1024] : memref<16x1158xf32, #tpu.memory_space<vmem>>, vector<16x128xf32>
    %c0_6 = arith.constant 0 : index
    %c1152 = arith.constant 1152 : index
    %6 = vector.load %arg3[%c0_6, %c1152] : memref<16x1158xf32, #tpu.memory_space<vmem>>, vector<16x6xf32>
    %7 = vector.extract_strided_slice %6 {offsets = [0, 0], sizes = [16, 4], strides = [1, 1]} : vector<16x6xf32> to vector<16x4xf32>
    %8 = vector.extract_strided_slice %6 {offsets = [0, 4], sizes = [16, 1], strides = [1, 1]} : vector<16x6xf32> to vector<16x1xf32>
    %9 = vector.extract_strided_slice %6 {offsets = [0, 5], sizes = [16, 1], strides = [1, 1]} : vector<16x6xf32> to vector<16x1xf32>
    %c0_7 = arith.constant 0 : index
    %c0_8 = arith.constant 0 : index
    %10 = vector.load %arg4[%c0_7, %c0_8] : memref<32x25xf32, #tpu.memory_space<vmem>>, vector<32x25xf32>
    %11 = vector.extract_strided_slice %10 {offsets = [0, 0], sizes = [32, 24], strides = [1, 1]} : vector<32x25xf32> to vector<32x24xf32>
    %12 = vector.extract_strided_slice %10 {offsets = [0, 24], sizes = [32, 1], strides = [1, 1]} : vector<32x25xf32> to vector<32x1xf32>
    %c0_9 = arith.constant 0 : index
    %c0_10 = arith.constant 0 : index
    %13 = vector.load %arg5[%c0_9, %c0_10] : memref<48x16xf32, #tpu.memory_space<vmem>>, vector<48x16xf32>
    %c0_11 = arith.constant 0 : index
    %c0_12 = arith.constant 0 : index
    %c0_13 = arith.constant 0 : index
    %14 = vector.load %arg1[%c0_11, %c0_12, %c0_13] : memref<1x32x16xf32, #tpu.memory_space<vmem>>, vector<1x32x16xf32>
    %15 = vector.shape_cast %14 : vector<1x32x16xf32> to vector<32x16xf32>
    %16 = arith.mulf %15, %15 : vector<32x16xf32>
    %cst = arith.constant dense<0.000000e+00> : vector<32xf32>
    %17 = vector.multi_reduction <add>, %16, %cst [1] : vector<32x16xf32> to vector<32xf32>
    %18 = vector.shape_cast %17 : vector<32xf32> to vector<32x1xf32>
    %cst_14 = arith.constant 1.600000e+01 : f32
    %19 = vector.broadcast %cst_14 : f32 to vector<32x1xf32>
    %20 = arith.divf %18, %19 : vector<32x1xf32>
    %cst_15 = arith.constant 9.99999974E-6 : f32
    %21 = vector.broadcast %cst_15 : f32 to vector<32x1xf32>
    %22 = arith.addf %20, %21 : vector<32x1xf32>
    %23 = math.rsqrt %22 : vector<32x1xf32>
    %24 = vector.broadcast %23 : vector<32x1xf32> to vector<32x16xf32>
    %25 = arith.mulf %15, %24 : vector<32x16xf32>
    %26 = vector.broadcast %12 : vector<32x1xf32> to vector<32x16xf32>
    %27 = arith.mulf %25, %26 : vector<32x16xf32>
    %cst_16 = arith.constant 0.000000e+00 : f32
    %28 = vector.broadcast %cst_16 : f32 to vector<32x1xf32>
    %29 = vector.extract_strided_slice %27 {offsets = [0, 0], sizes = [32, 15], strides = [1, 1]} : vector<32x16xf32> to vector<32x15xf32>
    %30 = tpu.concatenate %28, %29 in 1 : vector<32x1xf32>, vector<32x15xf32> -> vector<32x16xf32>
    %31 = vector.extract_strided_slice %27 {offsets = [0, 1], sizes = [32, 15], strides = [1, 1]} : vector<32x16xf32> to vector<32x15xf32>
    %32 = tpu.concatenate %31, %28 in 1 : vector<32x15xf32>, vector<32x1xf32> -> vector<32x16xf32>
    %33 = vector.extract_strided_slice %30 {offsets = [0, 0], sizes = [8, 16], strides = [1, 1]} : vector<32x16xf32> to vector<8x16xf32>
    %34 = vector.extract_strided_slice %27 {offsets = [0, 0], sizes = [8, 16], strides = [1, 1]} : vector<32x16xf32> to vector<8x16xf32>
    %35 = vector.extract_strided_slice %32 {offsets = [0, 0], sizes = [8, 16], strides = [1, 1]} : vector<32x16xf32> to vector<8x16xf32>
    %36 = tpu.concatenate %33, %34, %35 in 0 : vector<8x16xf32>, vector<8x16xf32>, vector<8x16xf32> -> vector<24x16xf32>
    %cst_17 = arith.constant dense<0.000000e+00> : vector<32x16xf32>
    %37 = tpu.matmul %11, %36, %cst_17 {dimension_numbers = #tpu.dot_dimension_numbers<[1], [0], [0], [1], [0, 0, 1, 1], [], []>} : vector<32x24xf32>, vector<24x16xf32>, vector<32x16xf32> -> vector<32x16xf32>
    %38 = vector.extract_strided_slice %30 {offsets = [8, 0], sizes = [8, 16], strides = [1, 1]} : vector<32x16xf32> to vector<8x16xf32>
    %39 = vector.extract_strided_slice %27 {offsets = [8, 0], sizes = [8, 16], strides = [1, 1]} : vector<32x16xf32> to vector<8x16xf32>
    %40 = vector.extract_strided_slice %32 {offsets = [8, 0], sizes = [8, 16], strides = [1, 1]} : vector<32x16xf32> to vector<8x16xf32>
    %41 = tpu.concatenate %38, %39, %40 in 0 : vector<8x16xf32>, vector<8x16xf32>, vector<8x16xf32> -> vector<24x16xf32>
    %cst_18 = arith.constant dense<0.000000e+00> : vector<32x16xf32>
    %42 = tpu.matmul %11, %41, %cst_18 {dimension_numbers = #tpu.dot_dimension_numbers<[1], [0], [0], [1], [0, 0, 1, 1], [], []>} : vector<32x24xf32>, vector<24x16xf32>, vector<32x16xf32> -> vector<32x16xf32>
    %43 = vector.extract_strided_slice %30 {offsets = [16, 0], sizes = [8, 16], strides = [1, 1]} : vector<32x16xf32> to vector<8x16xf32>
    %44 = vector.extract_strided_slice %27 {offsets = [16, 0], sizes = [8, 16], strides = [1, 1]} : vector<32x16xf32> to vector<8x16xf32>
    %45 = vector.extract_strided_slice %32 {offsets = [16, 0], sizes = [8, 16], strides = [1, 1]} : vector<32x16xf32> to vector<8x16xf32>
    %46 = tpu.concatenate %43, %44, %45 in 0 : vector<8x16xf32>, vector<8x16xf32>, vector<8x16xf32> -> vector<24x16xf32>
    %cst_19 = arith.constant dense<0.000000e+00> : vector<32x16xf32>
    %47 = tpu.matmul %11, %46, %cst_19 {dimension_numbers = #tpu.dot_dimension_numbers<[1], [0], [0], [1], [0, 0, 1, 1], [], []>} : vector<32x24xf32>, vector<24x16xf32>, vector<32x16xf32> -> vector<32x16xf32>
    %48 = vector.extract_strided_slice %30 {offsets = [24, 0], sizes = [8, 16], strides = [1, 1]} : vector<32x16xf32> to vector<8x16xf32>
    %49 = vector.extract_strided_slice %27 {offsets = [24, 0], sizes = [8, 16], strides = [1, 1]} : vector<32x16xf32> to vector<8x16xf32>
    %50 = vector.extract_strided_slice %32 {offsets = [24, 0], sizes = [8, 16], strides = [1, 1]} : vector<32x16xf32> to vector<8x16xf32>
    %51 = tpu.concatenate %48, %49, %50 in 0 : vector<8x16xf32>, vector<8x16xf32>, vector<8x16xf32> -> vector<24x16xf32>
    %cst_20 = arith.constant dense<0.000000e+00> : vector<32x16xf32>
    %52 = tpu.matmul %11, %51, %cst_20 {dimension_numbers = #tpu.dot_dimension_numbers<[1], [0], [0], [1], [0, 0, 1, 1], [], []>} : vector<32x24xf32>, vector<24x16xf32>, vector<32x16xf32> -> vector<32x16xf32>
    %53 = tpu.concatenate %37, %42, %47, %52 in 1 : vector<32x16xf32>, vector<32x16xf32>, vector<32x16xf32>, vector<32x16xf32> -> vector<32x64xf32>
    %54 = vector.extract_strided_slice %53 {offsets = [0, 0], sizes = [16, 64], strides = [1, 1]} : vector<32x64xf32> to vector<16x64xf32>
    %55 = vector.extract_strided_slice %53 {offsets = [16, 0], sizes = [16, 64], strides = [1, 1]} : vector<32x64xf32> to vector<16x64xf32>
    %56 = vector.extract_strided_slice %7 {offsets = [0, 3], sizes = [16, 1], strides = [1, 1]} : vector<16x4xf32> to vector<16x1xf32>
    %57 = vector.broadcast %56 : vector<16x1xf32> to vector<16x64xf32>
    %58 = arith.mulf %57, %54 : vector<16x64xf32>
    %59 = vector.broadcast %8 : vector<16x1xf32> to vector<16x64xf32>
    %60 = arith.addf %59, %58 : vector<16x64xf32>
    %cst_21 = arith.constant 0.000000e+00 : f32
    %61 = vector.broadcast %cst_21 : f32 to vector<16x48xf32>
    %62 = vector.extract_strided_slice %54 {offsets = [0, 0], sizes = [16, 16], strides = [1, 1]} : vector<16x64xf32> to vector<16x16xf32>
    %63 = tpu.concatenate %61, %62 in 1 : vector<16x48xf32>, vector<16x16xf32> -> vector<16x64xf32>
    %64 = vector.extract_strided_slice %7 {offsets = [0, 0], sizes = [16, 1], strides = [1, 1]} : vector<16x4xf32> to vector<16x1xf32>
    %65 = vector.broadcast %64 : vector<16x1xf32> to vector<16x64xf32>
    %66 = arith.mulf %65, %63 : vector<16x64xf32>
    %67 = arith.addf %60, %66 : vector<16x64xf32>
    %cst_22 = arith.constant 0.000000e+00 : f32
    %68 = vector.broadcast %cst_22 : f32 to vector<16x32xf32>
    %69 = vector.extract_strided_slice %54 {offsets = [0, 0], sizes = [16, 32], strides = [1, 1]} : vector<16x64xf32> to vector<16x32xf32>
    %70 = tpu.concatenate %68, %69 in 1 : vector<16x32xf32>, vector<16x32xf32> -> vector<16x64xf32>
    %71 = vector.extract_strided_slice %7 {offsets = [0, 1], sizes = [16, 1], strides = [1, 1]} : vector<16x4xf32> to vector<16x1xf32>
    %72 = vector.broadcast %71 : vector<16x1xf32> to vector<16x64xf32>
    %73 = arith.mulf %72, %70 : vector<16x64xf32>
    %74 = arith.addf %67, %73 : vector<16x64xf32>
    %cst_23 = arith.constant 0.000000e+00 : f32
    %75 = vector.broadcast %cst_23 : f32 to vector<16x16xf32>
    %76 = vector.extract_strided_slice %54 {offsets = [0, 0], sizes = [16, 48], strides = [1, 1]} : vector<16x64xf32> to vector<16x48xf32>
    %77 = tpu.concatenate %75, %76 in 1 : vector<16x16xf32>, vector<16x48xf32> -> vector<16x64xf32>
    %78 = vector.extract_strided_slice %7 {offsets = [0, 2], sizes = [16, 1], strides = [1, 1]} : vector<16x4xf32> to vector<16x1xf32>
    %79 = vector.broadcast %78 : vector<16x1xf32> to vector<16x64xf32>
    %80 = arith.mulf %79, %77 : vector<16x64xf32>
    %81 = arith.addf %74, %80 : vector<16x64xf32>
    %cst_24 = arith.constant 0.000000e+00 : f32
    %82 = vector.broadcast %cst_24 : f32 to vector<16x64xf32>
    %83 = arith.subf %82, %81 : vector<16x64xf32>
    %84 = math.exp %83 : vector<16x64xf32>
    %cst_25 = arith.constant 1.000000e+00 : f32
    %85 = vector.broadcast %cst_25 : f32 to vector<16x64xf32>
    %86 = arith.addf %85, %84 : vector<16x64xf32>
    %87 = tpu.reciprocal %86 : vector<16x64xf32> -> vector<16x64xf32>
    %88 = arith.mulf %81, %87 : vector<16x64xf32>
    %cst_26 = arith.constant 0.000000e+00 : f32
    %89 = vector.broadcast %cst_26 : f32 to vector<16x64xf32>
    %90 = arith.subf %89, %55 : vector<16x64xf32>
    %91 = math.exp %90 : vector<16x64xf32>
    %cst_27 = arith.constant 1.000000e+00 : f32
    %92 = vector.broadcast %cst_27 : f32 to vector<16x64xf32>
    %93 = arith.addf %92, %91 : vector<16x64xf32>
    %94 = tpu.reciprocal %93 : vector<16x64xf32> -> vector<16x64xf32>
    %95 = arith.mulf %55, %94 : vector<16x64xf32>
    %cst_28 = arith.constant dense<0.000000e+00> : vector<48x64xf32>
    %96 = tpu.matmul %13, %88, %cst_28 {dimension_numbers = #tpu.dot_dimension_numbers<[1], [0], [0], [1], [0, 0, 1, 1], [], []>} : vector<48x16xf32>, vector<16x64xf32>, vector<48x64xf32> -> vector<48x64xf32>
    %97 = vector.extract_strided_slice %96 {offsets = [0, 0], sizes = [16, 64], strides = [1, 1]} : vector<48x64xf32> to vector<16x64xf32>
    %98 = vector.broadcast %9 : vector<16x1xf32> to vector<16x64xf32>
    %99 = arith.addf %97, %98 : vector<16x64xf32>
    %cst_29 = arith.constant 0.000000e+00 : f32
    %100 = vector.broadcast %cst_29 : f32 to vector<16x64xf32>
    %101 = arith.maximumf %99, %100 : vector<16x64xf32>
    %102 = math.absf %99 : vector<16x64xf32>
    %cst_30 = arith.constant 0.000000e+00 : f32
    %103 = vector.broadcast %cst_30 : f32 to vector<16x64xf32>
    %104 = arith.subf %103, %102 : vector<16x64xf32>
    %105 = math.exp %104 : vector<16x64xf32>
    %cst_31 = arith.constant 1.000000e+00 : f32
    %106 = vector.broadcast %cst_31 : f32 to vector<16x64xf32>
    %107 = arith.addf %106, %105 : vector<16x64xf32>
    %108 = math.log %107 : vector<16x64xf32>
    %109 = arith.addf %101, %108 : vector<16x64xf32>
    %110 = vector.extract_strided_slice %96 {offsets = [16, 0], sizes = [16, 64], strides = [1, 1]} : vector<48x64xf32> to vector<16x64xf32>
    %111 = vector.extract_strided_slice %96 {offsets = [32, 0], sizes = [16, 64], strides = [1, 1]} : vector<48x64xf32> to vector<16x64xf32>
    %cst_32 = arith.constant 0.000000e+00 : f32
    %112 = vector.broadcast %cst_32 : f32 to vector<16x256xf32>
    %113 = vector.extract_strided_slice %109 {offsets = [0, 0], sizes = [16, 16], strides = [1, 1]} : vector<16x64xf32> to vector<16x16xf32>
    %114 = vector.extract_strided_slice %88 {offsets = [0, 0], sizes = [16, 16], strides = [1, 1]} : vector<16x64xf32> to vector<16x16xf32>
    %115 = vector.extract_strided_slice %95 {offsets = [0, 0], sizes = [16, 16], strides = [1, 1]} : vector<16x64xf32> to vector<16x16xf32>
    %116 = vector.extract_strided_slice %110 {offsets = [0, 0], sizes = [16, 16], strides = [1, 1]} : vector<16x64xf32> to vector<16x16xf32>
    %117 = vector.extract_strided_slice %111 {offsets = [0, 0], sizes = [16, 16], strides = [1, 1]} : vector<16x64xf32> to vector<16x16xf32>
    %cst_33 = arith.constant dense<0.000000e+00> : vector<16x256xf32>
    %118 = tpu.matmul %113, %1, %cst_33 {dimension_numbers = #tpu.dot_dimension_numbers<[1], [0], [0], [1], [0, 0, 1, 1], [], []>} : vector<16x16xf32>, vector<16x256xf32>, vector<16x256xf32> -> vector<16x256xf32>
    %cst_34 = arith.constant dense<0.000000e+00> : vector<16x256xf32>
    %119 = tpu.matmul %114, %1, %cst_34 {dimension_numbers = #tpu.dot_dimension_numbers<[1], [0], [0], [1], [0, 0, 1, 1], [], []>} : vector<16x16xf32>, vector<16x256xf32>, vector<16x256xf32> -> vector<16x256xf32>
    %cst_35 = arith.constant dense<0.000000e+00> : vector<16x256xf32>
    %120 = tpu.matmul %116, %1, %cst_35 {dimension_numbers = #tpu.dot_dimension_numbers<[1], [0], [0], [1], [0, 0, 1, 1], [], []>} : vector<16x16xf32>, vector<16x256xf32>, vector<16x256xf32> -> vector<16x256xf32>
    %121 = arith.mulf %120, %2 : vector<16x256xf32>
    %cst_36 = arith.constant dense<0.000000e+00> : vector<256xf32>
    %122 = vector.multi_reduction <add>, %121, %cst_36 [0] : vector<16x256xf32> to vector<256xf32>
    %123 = vector.shape_cast %122 : vector<256xf32> to vector<1x256xf32>
    %124 = arith.mulf %118, %0 : vector<16x256xf32>
    %125 = math.exp %124 : vector<16x256xf32>
    %126 = arith.mulf %125, %112 : vector<16x256xf32>
    %127 = arith.mulf %118, %119 : vector<16x256xf32>
    %128 = vector.broadcast %123 : vector<1x256xf32> to vector<16x256xf32>
    %129 = arith.mulf %127, %128 : vector<16x256xf32>
    %130 = arith.addf %126, %129 : vector<16x256xf32>
    %cst_37 = arith.constant dense<0.000000e+00> : vector<16x256xf32>
    %131 = tpu.matmul %117, %2, %cst_37 {dimension_numbers = #tpu.dot_dimension_numbers<[1], [0], [0], [1], [0, 0, 1, 1], [], []>} : vector<16x16xf32>, vector<16x256xf32>, vector<16x256xf32> -> vector<16x256xf32>
    %132 = arith.mulf %130, %131 : vector<16x256xf32>
    %cst_38 = arith.constant dense<0.000000e+00> : vector<16x16xf32>
    %133 = tpu.matmul %1, %132, %cst_38 {dimension_numbers = #tpu.dot_dimension_numbers<[1], [1], [0], [0], [0, 0, 1, 0], [], []>} : vector<16x256xf32>, vector<16x256xf32>, vector<16x16xf32> -> vector<16x16xf32>
    %cst_39 = arith.constant dense<0.000000e+00> : vector<16x128xf32>
    %134 = tpu.matmul %115, %5, %cst_39 {dimension_numbers = #tpu.dot_dimension_numbers<[1], [0], [0], [1], [0, 0, 1, 1], [], []>} : vector<16x16xf32>, vector<16x128xf32>, vector<16x128xf32> -> vector<16x128xf32>
    %cst_40 = arith.constant dense<0.000000e+00> : vector<16x128xf32>
    %135 = tpu.matmul %114, %5, %cst_40 {dimension_numbers = #tpu.dot_dimension_numbers<[1], [0], [0], [1], [0, 0, 1, 1], [], []>} : vector<16x16xf32>, vector<16x128xf32>, vector<16x128xf32> -> vector<16x128xf32>
    %136 = arith.mulf %3, %134 : vector<16x128xf32>
    %cst_41 = arith.constant dense<0.000000e+00> : vector<16x128xf32>
    %137 = tpu.matmul %133, %136, %cst_41 {dimension_numbers = #tpu.dot_dimension_numbers<[1], [0], [0], [1], [0, 0, 1, 1], [], []>} : vector<16x16xf32>, vector<16x128xf32>, vector<16x128xf32> -> vector<16x128xf32>
    %138 = arith.mulf %4, %134 : vector<16x128xf32>
    %139 = arith.mulf %138, %135 : vector<16x128xf32>
    %cst_42 = arith.constant dense<0.000000e+00> : vector<128xf32>
    %140 = vector.multi_reduction <add>, %139, %cst_42 [0] : vector<16x128xf32> to vector<128xf32>
    %141 = vector.shape_cast %140 : vector<128xf32> to vector<1x128xf32>
    %142 = vector.broadcast %141 : vector<1x128xf32> to vector<16x128xf32>
    %143 = arith.addf %137, %142 : vector<16x128xf32>
    %c0_43 = arith.constant 0 : index
    %c0_44 = arith.constant 0 : index
    %c0_45 = arith.constant 0 : index
    %c0_46 = arith.constant 0 : index
    %144 = vector.load %arg2[%c0_43, %c0_44, %c0_45, %c0_46] : memref<1x4x1x128xf32, #tpu.memory_space<vmem>>, vector<1x1x1x128xf32>
    %145 = vector.shape_cast %144 : vector<1x1x1x128xf32> to vector<1x128xf32>
    %146 = vector.broadcast %145 : vector<1x128xf32> to vector<16x128xf32>
    %147 = arith.addf %143, %146 : vector<16x128xf32>
    %c0_47 = arith.constant 0 : index
    %c0_48 = arith.constant 0 : index
    %c0_49 = arith.constant 0 : index
    %c0_50 = arith.constant 0 : index
    %148 = vector.load %arg6[%c0_47, %c0_48, %c0_49, %c0_50] : memref<1x4x16x128xf32, #tpu.memory_space<vmem>>, vector<1x1x16x128xf32>
    %149 = vector.shape_cast %148 : vector<1x1x16x128xf32> to vector<16x128xf32>
    %150 = vector.shape_cast %147 : vector<16x128xf32> to vector<1x1x16x128xf32>
    tpu.vector_store %arg6[%c0_47, %c0_48, %c0_49, %c0_50], %150 {strides = array<i32>} : memref<1x4x16x128xf32, #tpu.memory_space<vmem>>, vector<1x1x16x128xf32>,
    %151 = vector.extract_strided_slice %109 {offsets = [0, 16], sizes = [16, 16], strides = [1, 1]} : vector<16x64xf32> to vector<16x16xf32>
    %152 = vector.extract_strided_slice %88 {offsets = [0, 16], sizes = [16, 16], strides = [1, 1]} : vector<16x64xf32> to vector<16x16xf32>
    %153 = vector.extract_strided_slice %95 {offsets = [0, 16], sizes = [16, 16], strides = [1, 1]} : vector<16x64xf32> to vector<16x16xf32>
    %154 = vector.extract_strided_slice %110 {offsets = [0, 16], sizes = [16, 16], strides = [1, 1]} : vector<16x64xf32> to vector<16x16xf32>
    %155 = vector.extract_strided_slice %111 {offsets = [0, 16], sizes = [16, 16], strides = [1, 1]} : vector<16x64xf32> to vector<16x16xf32>
    %cst_51 = arith.constant dense<0.000000e+00> : vector<16x256xf32>
    %156 = tpu.matmul %151, %1, %cst_51 {dimension_numbers = #tpu.dot_dimension_numbers<[1], [0], [0], [1], [0, 0, 1, 1], [], []>} : vector<16x16xf32>, vector<16x256xf32>, vector<16x256xf32> -> vector<16x256xf32>
    %cst_52 = arith.constant dense<0.000000e+00> : vector<16x256xf32>
    %157 = tpu.matmul %152, %1, %cst_52 {dimension_numbers = #tpu.dot_dimension_numbers<[1], [0], [0], [1], [0, 0, 1, 1], [], []>} : vector<16x16xf32>, vector<16x256xf32>, vector<16x256xf32> -> vector<16x256xf32>
    %cst_53 = arith.constant dense<0.000000e+00> : vector<16x256xf32>
    %158 = tpu.matmul %154, %1, %cst_53 {dimension_numbers = #tpu.dot_dimension_numbers<[1], [0], [0], [1], [0, 0, 1, 1], [], []>} : vector<16x16xf32>, vector<16x256xf32>, vector<16x256xf32> -> vector<16x256xf32>
    %159 = arith.mulf %158, %2 : vector<16x256xf32>
    %cst_54 = arith.constant dense<0.000000e+00> : vector<256xf32>
    %160 = vector.multi_reduction <add>, %159, %cst_54 [0] : vector<16x256xf32> to vector<256xf32>
    %161 = vector.shape_cast %160 : vector<256xf32> to vector<1x256xf32>
    %162 = arith.mulf %156, %0 : vector<16x256xf32>
    %163 = math.exp %162 : vector<16x256xf32>
    %164 = arith.mulf %163, %130 : vector<16x256xf32>
    %165 = arith.mulf %156, %157 : vector<16x256xf32>
    %166 = vector.broadcast %161 : vector<1x256xf32> to vector<16x256xf32>
    %167 = arith.mulf %165, %166 : vector<16x256xf32>
    %168 = arith.addf %164, %167 : vector<16x256xf32>
    %cst_55 = arith.constant dense<0.000000e+00> : vector<16x256xf32>
    %169 = tpu.matmul %155, %2, %cst_55 {dimension_numbers = #tpu.dot_dimension_numbers<[1], [0], [0], [1], [0, 0, 1, 1], [], []>} : vector<16x16xf32>, vector<16x256xf32>, vector<16x256xf32> -> vector<16x256xf32>
    %170 = arith.mulf %168, %169 : vector<16x256xf32>
    %cst_56 = arith.constant dense<0.000000e+00> : vector<16x16xf32>
    %171 = tpu.matmul %1, %170, %cst_56 {dimension_numbers = #tpu.dot_dimension_numbers<[1], [1], [0], [0], [0, 0, 1, 0], [], []>} : vector<16x256xf32>, vector<16x256xf32>, vector<16x16xf32> -> vector<16x16xf32>
    %cst_57 = arith.constant dense<0.000000e+00> : vector<16x128xf32>
    %172 = tpu.matmul %153, %5, %cst_57 {dimension_numbers = #tpu.dot_dimension_numbers<[1], [0], [0], [1], [0, 0, 1, 1], [], []>} : vector<16x16xf32>, vector<16x128xf32>, vector<16x128xf32> -> vector<16x128xf32>
    %cst_58 = arith.constant dense<0.000000e+00> : vector<16x128xf32>
    %173 = tpu.matmul %152, %5, %cst_58 {dimension_numbers = #tpu.dot_dimension_numbers<[1], [0], [0], [1], [0, 0, 1, 1], [], []>} : vector<16x16xf32>, vector<16x128xf32>, vector<16x128xf32> -> vector<16x128xf32>
    %174 = arith.mulf %3, %172 : vector<16x128xf32>
    %cst_59 = arith.constant dense<0.000000e+00> : vector<16x128xf32>
    %175 = tpu.matmul %171, %174, %cst_59 {dimension_numbers = #tpu.dot_dimension_numbers<[1], [0], [0], [1], [0, 0, 1, 1], [], []>} : vector<16x16xf32>, vector<16x128xf32>, vector<16x128xf32> -> vector<16x128xf32>
    %176 = arith.mulf %4, %172 : vector<16x128xf32>
    %177 = arith.mulf %176, %173 : vector<16x128xf32>
    %cst_60 = arith.constant dense<0.000000e+00> : vector<128xf32>
    %178 = vector.multi_reduction <add>, %177, %cst_60 [0] : vector<16x128xf32> to vector<128xf32>
    %179 = vector.shape_cast %178 : vector<128xf32> to vector<1x128xf32>
    %180 = vector.broadcast %179 : vector<1x128xf32> to vector<16x128xf32>
    %181 = arith.addf %175, %180 : vector<16x128xf32>
    %c0_61 = arith.constant 0 : index
    %c1 = arith.constant 1 : index
    %c0_62 = arith.constant 0 : index
    %c0_63 = arith.constant 0 : index
    %182 = vector.load %arg2[%c0_61, %c1, %c0_62, %c0_63] : memref<1x4x1x128xf32, #tpu.memory_space<vmem>>, vector<1x1x1x128xf32>
    %183 = vector.shape_cast %182 : vector<1x1x1x128xf32> to vector<1x128xf32>
    %184 = vector.broadcast %183 : vector<1x128xf32> to vector<16x128xf32>
    %185 = arith.addf %181, %184 : vector<16x128xf32>
    %c0_64 = arith.constant 0 : index
    %c1_65 = arith.constant 1 : index
    %c0_66 = arith.constant 0 : index
    %c0_67 = arith.constant 0 : index
    %186 = vector.load %arg6[%c0_64, %c1_65, %c0_66, %c0_67] : memref<1x4x16x128xf32, #tpu.memory_space<vmem>>, vector<1x1x16x128xf32>
    %187 = vector.shape_cast %186 : vector<1x1x16x128xf32> to vector<16x128xf32>
    %188 = vector.shape_cast %185 : vector<16x128xf32> to vector<1x1x16x128xf32>
    tpu.vector_store %arg6[%c0_64, %c1_65, %c0_66, %c0_67], %188 {strides = array<i32>} : memref<1x4x16x128xf32, #tpu.memory_space<vmem>>, vector<1x1x16x128xf32>,
    %189 = vector.extract_strided_slice %109 {offsets = [0, 32], sizes = [16, 16], strides = [1, 1]} : vector<16x64xf32> to vector<16x16xf32>
    %190 = vector.extract_strided_slice %88 {offsets = [0, 32], sizes = [16, 16], strides = [1, 1]} : vector<16x64xf32> to vector<16x16xf32>
    %191 = vector.extract_strided_slice %95 {offsets = [0, 32], sizes = [16, 16], strides = [1, 1]} : vector<16x64xf32> to vector<16x16xf32>
    %192 = vector.extract_strided_slice %110 {offsets = [0, 32], sizes = [16, 16], strides = [1, 1]} : vector<16x64xf32> to vector<16x16xf32>
    %193 = vector.extract_strided_slice %111 {offsets = [0, 32], sizes = [16, 16], strides = [1, 1]} : vector<16x64xf32> to vector<16x16xf32>
    %cst_68 = arith.constant dense<0.000000e+00> : vector<16x256xf32>
    %194 = tpu.matmul %189, %1, %cst_68 {dimension_numbers = #tpu.dot_dimension_numbers<[1], [0], [0], [1], [0, 0, 1, 1], [], []>} : vector<16x16xf32>, vector<16x256xf32>, vector<16x256xf32> -> vector<16x256xf32>
    %cst_69 = arith.constant dense<0.000000e+00> : vector<16x256xf32>
    %195 = tpu.matmul %190, %1, %cst_69 {dimension_numbers = #tpu.dot_dimension_numbers<[1], [0], [0], [1], [0, 0, 1, 1], [], []>} : vector<16x16xf32>, vector<16x256xf32>, vector<16x256xf32> -> vector<16x256xf32>
    %cst_70 = arith.constant dense<0.000000e+00> : vector<16x256xf32>
    %196 = tpu.matmul %192, %1, %cst_70 {dimension_numbers = #tpu.dot_dimension_numbers<[1], [0], [0], [1], [0, 0, 1, 1], [], []>} : vector<16x16xf32>, vector<16x256xf32>, vector<16x256xf32> -> vector<16x256xf32>
    %197 = arith.mulf %196, %2 : vector<16x256xf32>
    %cst_71 = arith.constant dense<0.000000e+00> : vector<256xf32>
    %198 = vector.multi_reduction <add>, %197, %cst_71 [0] : vector<16x256xf32> to vector<256xf32>
    %199 = vector.shape_cast %198 : vector<256xf32> to vector<1x256xf32>
    %200 = arith.mulf %194, %0 : vector<16x256xf32>
    %201 = math.exp %200 : vector<16x256xf32>
    %202 = arith.mulf %201, %168 : vector<16x256xf32>
    %203 = arith.mulf %194, %195 : vector<16x256xf32>
    %204 = vector.broadcast %199 : vector<1x256xf32> to vector<16x256xf32>
    %205 = arith.mulf %203, %204 : vector<16x256xf32>
    %206 = arith.addf %202, %205 : vector<16x256xf32>
    %cst_72 = arith.constant dense<0.000000e+00> : vector<16x256xf32>
    %207 = tpu.matmul %193, %2, %cst_72 {dimension_numbers = #tpu.dot_dimension_numbers<[1], [0], [0], [1], [0, 0, 1, 1], [], []>} : vector<16x16xf32>, vector<16x256xf32>, vector<16x256xf32> -> vector<16x256xf32>
    %208 = arith.mulf %206, %207 : vector<16x256xf32>
    %cst_73 = arith.constant dense<0.000000e+00> : vector<16x16xf32>
    %209 = tpu.matmul %1, %208, %cst_73 {dimension_numbers = #tpu.dot_dimension_numbers<[1], [1], [0], [0], [0, 0, 1, 0], [], []>} : vector<16x256xf32>, vector<16x256xf32>, vector<16x16xf32> -> vector<16x16xf32>
    %cst_74 = arith.constant dense<0.000000e+00> : vector<16x128xf32>
    %210 = tpu.matmul %191, %5, %cst_74 {dimension_numbers = #tpu.dot_dimension_numbers<[1], [0], [0], [1], [0, 0, 1, 1], [], []>} : vector<16x16xf32>, vector<16x128xf32>, vector<16x128xf32> -> vector<16x128xf32>
    %cst_75 = arith.constant dense<0.000000e+00> : vector<16x128xf32>
    %211 = tpu.matmul %190, %5, %cst_75 {dimension_numbers = #tpu.dot_dimension_numbers<[1], [0], [0], [1], [0, 0, 1, 1], [], []>} : vector<16x16xf32>, vector<16x128xf32>, vector<16x128xf32> -> vector<16x128xf32>
    %212 = arith.mulf %3, %210 : vector<16x128xf32>
    %cst_76 = arith.constant dense<0.000000e+00> : vector<16x128xf32>
    %213 = tpu.matmul %209, %212, %cst_76 {dimension_numbers = #tpu.dot_dimension_numbers<[1], [0], [0], [1], [0, 0, 1, 1], [], []>} : vector<16x16xf32>, vector<16x128xf32>, vector<16x128xf32> -> vector<16x128xf32>
    %214 = arith.mulf %4, %210 : vector<16x128xf32>
    %215 = arith.mulf %214, %211 : vector<16x128xf32>
    %cst_77 = arith.constant dense<0.000000e+00> : vector<128xf32>
    %216 = vector.multi_reduction <add>, %215, %cst_77 [0] : vector<16x128xf32> to vector<128xf32>
    %217 = vector.shape_cast %216 : vector<128xf32> to vector<1x128xf32>
    %218 = vector.broadcast %217 : vector<1x128xf32> to vector<16x128xf32>
    %219 = arith.addf %213, %218 : vector<16x128xf32>
    %c0_78 = arith.constant 0 : index
    %c2 = arith.constant 2 : index
    %c0_79 = arith.constant 0 : index
    %c0_80 = arith.constant 0 : index
    %220 = vector.load %arg2[%c0_78, %c2, %c0_79, %c0_80] : memref<1x4x1x128xf32, #tpu.memory_space<vmem>>, vector<1x1x1x128xf32>
    %221 = vector.shape_cast %220 : vector<1x1x1x128xf32> to vector<1x128xf32>
    %222 = vector.broadcast %221 : vector<1x128xf32> to vector<16x128xf32>
    %223 = arith.addf %219, %222 : vector<16x128xf32>
    %c0_81 = arith.constant 0 : index
    %c2_82 = arith.constant 2 : index
    %c0_83 = arith.constant 0 : index
    %c0_84 = arith.constant 0 : index
    %224 = vector.load %arg6[%c0_81, %c2_82, %c0_83, %c0_84] : memref<1x4x16x128xf32, #tpu.memory_space<vmem>>, vector<1x1x16x128xf32>
    %225 = vector.shape_cast %224 : vector<1x1x16x128xf32> to vector<16x128xf32>
    %226 = vector.shape_cast %223 : vector<16x128xf32> to vector<1x1x16x128xf32>
    tpu.vector_store %arg6[%c0_81, %c2_82, %c0_83, %c0_84], %226 {strides = array<i32>} : memref<1x4x16x128xf32, #tpu.memory_space<vmem>>, vector<1x1x16x128xf32>,
    %227 = vector.extract_strided_slice %109 {offsets = [0, 48], sizes = [16, 16], strides = [1, 1]} : vector<16x64xf32> to vector<16x16xf32>
    %228 = vector.extract_strided_slice %88 {offsets = [0, 48], sizes = [16, 16], strides = [1, 1]} : vector<16x64xf32> to vector<16x16xf32>
    %229 = vector.extract_strided_slice %95 {offsets = [0, 48], sizes = [16, 16], strides = [1, 1]} : vector<16x64xf32> to vector<16x16xf32>
    %230 = vector.extract_strided_slice %110 {offsets = [0, 48], sizes = [16, 16], strides = [1, 1]} : vector<16x64xf32> to vector<16x16xf32>
    %231 = vector.extract_strided_slice %111 {offsets = [0, 48], sizes = [16, 16], strides = [1, 1]} : vector<16x64xf32> to vector<16x16xf32>
    %cst_85 = arith.constant dense<0.000000e+00> : vector<16x256xf32>
    %232 = tpu.matmul %227, %1, %cst_85 {dimension_numbers = #tpu.dot_dimension_numbers<[1], [0], [0], [1], [0, 0, 1, 1], [], []>} : vector<16x16xf32>, vector<16x256xf32>, vector<16x256xf32> -> vector<16x256xf32>
    %cst_86 = arith.constant dense<0.000000e+00> : vector<16x256xf32>
    %233 = tpu.matmul %228, %1, %cst_86 {dimension_numbers = #tpu.dot_dimension_numbers<[1], [0], [0], [1], [0, 0, 1, 1], [], []>} : vector<16x16xf32>, vector<16x256xf32>, vector<16x256xf32> -> vector<16x256xf32>
    %cst_87 = arith.constant dense<0.000000e+00> : vector<16x256xf32>
    %234 = tpu.matmul %230, %1, %cst_87 {dimension_numbers = #tpu.dot_dimension_numbers<[1], [0], [0], [1], [0, 0, 1, 1], [], []>} : vector<16x16xf32>, vector<16x256xf32>, vector<16x256xf32> -> vector<16x256xf32>
    %235 = arith.mulf %234, %2 : vector<16x256xf32>
    %cst_88 = arith.constant dense<0.000000e+00> : vector<256xf32>
    %236 = vector.multi_reduction <add>, %235, %cst_88 [0] : vector<16x256xf32> to vector<256xf32>
    %237 = vector.shape_cast %236 : vector<256xf32> to vector<1x256xf32>
    %238 = arith.mulf %232, %0 : vector<16x256xf32>
    %239 = math.exp %238 : vector<16x256xf32>
    %240 = arith.mulf %239, %206 : vector<16x256xf32>
    %241 = arith.mulf %232, %233 : vector<16x256xf32>
    %242 = vector.broadcast %237 : vector<1x256xf32> to vector<16x256xf32>
    %243 = arith.mulf %241, %242 : vector<16x256xf32>
    %244 = arith.addf %240, %243 : vector<16x256xf32>
    %cst_89 = arith.constant dense<0.000000e+00> : vector<16x256xf32>
    %245 = tpu.matmul %231, %2, %cst_89 {dimension_numbers = #tpu.dot_dimension_numbers<[1], [0], [0], [1], [0, 0, 1, 1], [], []>} : vector<16x16xf32>, vector<16x256xf32>, vector<16x256xf32> -> vector<16x256xf32>
    %246 = arith.mulf %244, %245 : vector<16x256xf32>
    %cst_90 = arith.constant dense<0.000000e+00> : vector<16x16xf32>
    %247 = tpu.matmul %1, %246, %cst_90 {dimension_numbers = #tpu.dot_dimension_numbers<[1], [1], [0], [0], [0, 0, 1, 0], [], []>} : vector<16x256xf32>, vector<16x256xf32>, vector<16x16xf32> -> vector<16x16xf32>
    %cst_91 = arith.constant dense<0.000000e+00> : vector<16x128xf32>
    %248 = tpu.matmul %229, %5, %cst_91 {dimension_numbers = #tpu.dot_dimension_numbers<[1], [0], [0], [1], [0, 0, 1, 1], [], []>} : vector<16x16xf32>, vector<16x128xf32>, vector<16x128xf32> -> vector<16x128xf32>
    %cst_92 = arith.constant dense<0.000000e+00> : vector<16x128xf32>
    %249 = tpu.matmul %228, %5, %cst_92 {dimension_numbers = #tpu.dot_dimension_numbers<[1], [0], [0], [1], [0, 0, 1, 1], [], []>} : vector<16x16xf32>, vector<16x128xf32>, vector<16x128xf32> -> vector<16x128xf32>
    %250 = arith.mulf %3, %248 : vector<16x128xf32>
    %cst_93 = arith.constant dense<0.000000e+00> : vector<16x128xf32>
    %251 = tpu.matmul %247, %250, %cst_93 {dimension_numbers = #tpu.dot_dimension_numbers<[1], [0], [0], [1], [0, 0, 1, 1], [], []>} : vector<16x16xf32>, vector<16x128xf32>, vector<16x128xf32> -> vector<16x128xf32>
    %252 = arith.mulf %4, %248 : vector<16x128xf32>
    %253 = arith.mulf %252, %249 : vector<16x128xf32>
    %cst_94 = arith.constant dense<0.000000e+00> : vector<128xf32>
    %254 = vector.multi_reduction <add>, %253, %cst_94 [0] : vector<16x128xf32> to vector<128xf32>
    %255 = vector.shape_cast %254 : vector<128xf32> to vector<1x128xf32>
    %256 = vector.broadcast %255 : vector<1x128xf32> to vector<16x128xf32>
    %257 = arith.addf %251, %256 : vector<16x128xf32>
    %c0_95 = arith.constant 0 : index
    %c3 = arith.constant 3 : index
    %c0_96 = arith.constant 0 : index
    %c0_97 = arith.constant 0 : index
    %258 = vector.load %arg2[%c0_95, %c3, %c0_96, %c0_97] : memref<1x4x1x128xf32, #tpu.memory_space<vmem>>, vector<1x1x1x128xf32>
    %259 = vector.shape_cast %258 : vector<1x1x1x128xf32> to vector<1x128xf32>
    %260 = vector.broadcast %259 : vector<1x128xf32> to vector<16x128xf32>
    %261 = arith.addf %257, %260 : vector<16x128xf32>
    %c0_98 = arith.constant 0 : index
    %c3_99 = arith.constant 3 : index
    %c0_100 = arith.constant 0 : index
    %c0_101 = arith.constant 0 : index
    %262 = vector.load %arg6[%c0_98, %c3_99, %c0_100, %c0_101] : memref<1x4x16x128xf32, #tpu.memory_space<vmem>>, vector<1x1x16x128xf32>
    %263 = vector.shape_cast %262 : vector<1x1x16x128xf32> to vector<16x128xf32>
    %264 = vector.shape_cast %261 : vector<16x128xf32> to vector<1x1x16x128xf32>
    tpu.vector_store %arg6[%c0_98, %c3_99, %c0_100, %c0_101], %264 {strides = array<i32>} : memref<1x4x16x128xf32, #tpu.memory_space<vmem>>, vector<1x1x16x128xf32>,
    return
  }
  func.func @transform_0(%arg0: i32) -> (i32, i32, i32) {
    %c0_i32 = arith.constant 0 : i32
    %c0_i32_0 = arith.constant 0 : i32
    %c0_i32_1 = arith.constant 0 : i32
    return %arg0, %c0_i32, %c0_i32_0 : i32, i32, i32
  }
  func.func @transform_1(%arg0: i32) -> (i32, i32, i32, i32) {
    %c0_i32 = arith.constant 0 : i32
    %c0_i32_0 = arith.constant 0 : i32
    %c0_i32_1 = arith.constant 0 : i32
    %c0_i32_2 = arith.constant 0 : i32
    return %arg0, %c0_i32, %c0_i32_0, %c0_i32_1 : i32, i32, i32, i32
  }
  func.func @transform_2(%arg0: i32) -> (i32, i32) {
    %c0_i32 = arith.constant 0 : i32
    %c0_i32_0 = arith.constant 0 : i32
    %c0_i32_1 = arith.constant 0 : i32
    return %c0_i32, %c0_i32_0 : i32, i32
  }
  func.func @transform_3(%arg0: i32) -> (i32, i32) {
    %c0_i32 = arith.constant 0 : i32
    %c0_i32_0 = arith.constant 0 : i32
    %c0_i32_1 = arith.constant 0 : i32
    return %c0_i32, %c0_i32_0 : i32, i32
  }
  func.func @transform_4(%arg0: i32) -> (i32, i32) {
    %c0_i32 = arith.constant 0 : i32
    %c0_i32_0 = arith.constant 0 : i32
    %c0_i32_1 = arith.constant 0 : i32
    return %c0_i32, %c0_i32_0 : i32, i32
  }
  func.func @transform_5(%arg0: i32) -> (i32, i32, i32, i32) {
    %c0_i32 = arith.constant 0 : i32
    %c0_i32_0 = arith.constant 0 : i32
    %c0_i32_1 = arith.constant 0 : i32
    %c0_i32_2 = arith.constant 0 : i32
    return %arg0, %c0_i32, %c0_i32_0, %c0_i32_1 : i32, i32, i32, i32
  }
}

</mosaic_0001>

<bundles_post_ra>
// kernel: tile.21
= control target key start
LH: loop header
LB: loop body
LE: loop exit
PB: predicated region body
PF: predicated region fallthrough
CT: control target
= control target key end

     0   :  { %s22_s0 = inlined_call_operand.vmem [shape: f32[8], index: 0, kind: input, shape index: {}]   ;;  %s23_s1 = inlined_call_operand.vmem [shape: f32[4,1,1,8], index: 1, kind: output, shape index: {}]  }
   0x1   :  { %v4_v0 = vld [vmem:[%s22_s0] ss:$0 sm:$0xff] }
   0x2   :  { %5 = vst [vmem:[%s23_s1] sm:$0xf] %v4_v0 }

// kernel: mul.5
= control target key start
LH: loop header
LB: loop body
LE: loop exit
PB: predicated region body
PF: predicated region fallthrough
CT: control target
= control target key end

     0   :  { %s67_s10 = smov 112   ;;  %s68_s11 = smov 80   ;;  %vm3_vm0 = vcmask 130048   ;;  %vm9_vm1 = vcmask 1048448   ;;  %vm15_vm2 = vcmask 917248   ;;  %vm21_vm3 = vcmask 786048   ;;  %s111_s0 = inlined_call_operand.vmem [shape: f32[8,16], index: 0, kind: input, shape index: {}]   ;;  %s112_s1 = inlined_call_operand.vmem [shape: f32[128], index: 1, kind: output, shape index: {}]  }
   0x1   :  { %v53_v0 = vld [vmem:[%s111_s0 + $0x7] sm:$0x1]   ;;  %v55_v1 = vld [vmem:[%s111_s0 + $0x5] sm:$0x1]   ;;  %v54_v2 = vld [vmem:[%s111_s0 + $0x6] sm:$0x1]  }
   0x2   :  { %7 = vrot.lane.b32.xlu0 %v53_v0, %s67_s10  ;;  %19 = vrot.lane.b32.xlu1 %v55_v1, %s68_s11  ;;  %v56_v3 = vld [vmem:[%s111_s0 + $0x4] sm:$0x1]   ;;  %v2_v4 = vld [vmem:[%s111_s0] sm:$0x1]   ;;  %s69_s18 = smov 96   ;;  %s70_s19 = smov 64  }
   0x3   :  { %4 = vst.msk [vmem:[#allocation0] sm:$0x1] %vm3_vm0, %v2_v4   ;;  %v57_v5 = vld [vmem:[%s111_s0 + $0x3] sm:$0x1]   ;;  %v58_v6 = vld [vmem:[%s111_s0 + $0x2] sm:$0x1]  }
   0x4   :  { %s71_s24 = smov 48   ;;  %s72_s25 = smov 32   ;;  %v59_v7 = vld [vmem:[%s111_s0 + $0x1] sm:$0x1]   ;;  %vm27_vm4 = vcmask 654848   ;;  %vm33_vm5 = vcmask 523648  }
   0x5   :  { %s73_s0 = smov 16   ;;  %vm39_vm6 = vcmask 392448   ;;  %vm45_vm7 = vcmask 261248  }
   0x6   :  { %13 = vrot.lane.b32.xlu0 %v54_v2, %s69_s18  ;;  %25 = vrot.lane.b32.xlu1 %v56_v3, %s70_s19 }
   0xa   :  { %31 = vrot.lane.b32.xlu0 %v57_v5, %s71_s24  ;;  %37 = vrot.lane.b32.xlu1 %v58_v6, %s72_s25 }
   0xe   :  { %43 = vrot.lane.b32.xlu0 %v59_v7, %s73_s0 }
  0x74   :  { %v8_v8 = vpop.permute.xlu0 %7   ;;  %v20_v9 = vpop.permute.xlu1 %19  }
  0x75   :  { %10 = vst.msk [vmem:[#allocation0] sm:$0x1] %vm9_vm1, %v8_v8  }
  0x78   :  { %v14_v10 = vpop.permute.xlu0 %13   ;;  %v26_v11 = vpop.permute.xlu1 %25  }
  0x79   :  { %16 = vst.msk [vmem:[#allocation0] sm:$0x1] %vm15_vm2, %v14_v10  }
  0x7a   :  { %22 = vst.msk [vmem:[#allocation0] sm:$0x1] %vm21_vm3, %v20_v9  }
  0x7b   :  { %28 = vst.msk [vmem:[#allocation0] sm:$0x1] %vm27_vm4, %v26_v11  }
  0x7c   :  { %v32_v12 = vpop.permute.xlu0 %31   ;;  %v38_v13 = vpop.permute.xlu1 %37  }
  0x7d   :  { %34 = vst.msk [vmem:[#allocation0] sm:$0x1] %vm33_vm5, %v32_v12  }
  0x7e   :  { %40 = vst.msk [vmem:[#allocation0] sm:$0x1] %vm39_vm6, %v38_v13  }
  0x80   :  { %v44_v14 = vpop.permute.xlu0 %43  }
  0x81   :  { %46 = vst.msk [vmem:[#allocation0] sm:$0x1] %vm45_vm7, %v44_v14  }
  0x88   :  { %v50_v15 = vld [vmem:[#allocation0] sm:$0x1] }
  0x89   :  { %52 = vst [vmem:[%s112_s1] sm:$0x1] %v50_v15 }

// kernel: tile.36
= control target key start
LH: loop header
LB: loop body
LE: loop exit
PB: predicated region body
PF: predicated region fallthrough
CT: control target
= control target key end

     0   :  { %s22_s0 = inlined_call_operand.vmem [shape: f32[16], index: 0, kind: input, shape index: {}]   ;;  %s23_s1 = inlined_call_operand.vmem [shape: f32[8,16], index: 1, kind: output, shape index: {}]  }
   0x1   :  { %v4_v0 = vld [vmem:[%s22_s0] ss:$0 sm:$0xff] }
   0x2   :  { %5 = vst [vmem:[%s23_s1] sm:$0xff] %v4_v0 }

// kernel: tile.0
= control target key start
LH: loop header
LB: loop body
LE: loop exit
PB: predicated region body
PF: predicated region fallthrough
CT: control target
= control target key end

     0   :  { %s66_s8 = smov 125   ;;  %vm7_vm0 = vcmask 7168   ;;  %s67_s11 = smov 126   ;;  %s117_s0 = inlined_call_operand.vmem [shape: f32[4,1,1,8], index: 0, kind: input, shape index: {}]   ;;  %s118_s1 = inlined_call_operand.vmem [shape: f32[32,1], index: 1, kind: output, shape index: {}]  }
   0x1   :  { %v4_v0 = vld [vmem:[%s117_s0] sm:$0xf]  ;;  %s65_s0 = smov 127   ;;  %s68_s12 = smov 124  }
   0x2   :  { %5 = vst [vmem:[#allocation0] sm:$0xf] %v4_v0  ;;  %s69_s13 = smov 123   ;;  %s70_s14 = smov 122  }
   0x3   :  { %s71_s15 = smov 121  }
   0x9   :  { %v9_v1 = vld [vmem:[#allocation0] sm:$0xf]  }
   0xa   :  { %v21_v2 = vld [vmem:[#allocation0] sm:$0xf]   ;;  %10 = vrot.lane.b32.xlu0 %v9_v1, %s65_s0 }
   0xb   :  { %22 = vrot.lane.b32.xlu1 %v21_v2, %s66_s8  ;;  %v15_v3 = vld [vmem:[#allocation0] sm:$0xf]  }
   0xc   :  { %v27_v4 = vld [vmem:[#allocation0] sm:$0xf]  }
   0xd   :  { %v6_v5 = vld [vmem:[#allocation0] sm:$0xf]  }
   0xe   :  { %8 = vst.msk [vmem:[%s118_s1] ss:$8 sm:$0xf] %vm7_vm0, %v6_v5   ;;  %16 = vrot.lane.b32.xlu0 %v15_v3, %s67_s11  ;;  %v33_v6 = vld [vmem:[#allocation0] sm:$0xf]  }
   0xf   :  { %28 = vrot.lane.b32.xlu1 %v27_v4, %s68_s12  ;;  %v39_v7 = vld [vmem:[#allocation0] sm:$0xf]  }
  0x10   :  { %v45_v8 = vld [vmem:[#allocation0] sm:$0xf]  }
  0x12   :  { %34 = vrot.lane.b32.xlu0 %v33_v6, %s69_s13 }
  0x13   :  { %40 = vrot.lane.b32.xlu1 %v39_v7, %s70_s14 }
  0x16   :  { %46 = vrot.lane.b32.xlu0 %v45_v8, %s71_s15 }
  0x7c   :  { %v11_v9 = vpop.permute.xlu0 %10  }
  0x7d   :  { %v23_v10 = vpop.permute.xlu1 %22   ;;  %51 = vst.msk [vmem:[%s118_s1 + $0x1] ss:$8 sm:$0xf] %vm7_vm0, %v11_v9  }
  0x7e   :  { %53 = vst.msk [vmem:[%s118_s1 + $0x3] ss:$8 sm:$0xf] %vm7_vm0, %v23_v10  }
  0x80   :  { %v17_v11 = vpop.permute.xlu0 %16  }
  0x81   :  { %v29_v12 = vpop.permute.xlu1 %28   ;;  %52 = vst.msk [vmem:[%s118_s1 + $0x2] ss:$8 sm:$0xf] %vm7_vm0, %v17_v11  }
  0x82   :  { %54 = vst.msk [vmem:[%s118_s1 + $0x4] ss:$8 sm:$0xf] %vm7_vm0, %v29_v12  }
  0x84   :  { %v35_v13 = vpop.permute.xlu0 %34  }
  0x85   :  { %v41_v14 = vpop.permute.xlu1 %40   ;;  %55 = vst.msk [vmem:[%s118_s1 + $0x5] ss:$8 sm:$0xf] %vm7_vm0, %v35_v13  }
  0x86   :  { %56 = vst.msk [vmem:[%s118_s1 + $0x6] ss:$8 sm:$0xf] %vm7_vm0, %v41_v14  }
  0x88   :  { %v47_v15 = vpop.permute.xlu0 %46  }
  0x89   :  { %57 = vst.msk [vmem:[%s118_s1 + $0x7] ss:$8 sm:$0xf] %vm7_vm0, %v47_v15  }

// kernel: mamba_forward.1
= control target key start
LH: loop header
LB: loop body
LE: loop exit
PB: predicated region body
PF: predicated region fallthrough
CT: control target
= control target key end

     0   :  { %s4680_s18 = smov 0   ;;  %s5386_s0 = inlined_call_operand.vmem [shape: f32[2,32,16], index: 0, kind: input, shape index: {}]   ;;  %s5387_s1 = inlined_call_operand.vmem [shape: f32[2,4,1,128], index: 1, kind: input, shape index: {}]   ;;  %s5388_s2 = inlined_call_operand.vmem [shape: f32[16,1158], index: 2, kind: input, shape index: {}]   ;;  %s5389_s3 = inlined_call_operand.vmem [shape: f32[32,25], index: 3, kind: input, shape index: {}]   ;;  %s5390_s4 = inlined_call_operand.vmem [shape: f32[48,16], index: 4, kind: input, shape index: {}]   ;;  %s5391_s5 = inlined_call_operand.vmem [shape: f32[2,4,16,128], index: 5, kind: output, shape index: {}]  }
   0x1 LB: > { %s4007_s19 = sadd.s32 4294967295, %s4631_s18   ;;  %p4011_p0 = scmp.ge.s32.totalorder %s4631_s18, 1  ;;  %s4631_s18 = sphi %s4680_s18, %s15_s18  }
   0x2   : > { %p196_p1 = scmp.lt.s32.totalorder %s4631_s18, 3 }
   0x4   : > { %p197_p2 = pnand %p4011_p0, %p196_p1 }
   0x5   : > { %p228_p3 = scmp.lt.s32.totalorder (!%p197_p2), %s4007_s19, 1  ;;  %v4633_v0 = vmov (!%p197_p2), 24   ;;  %vm280_vm0 = vcmask (!%p197_p2), 130048   ;;  %v4705_v13 = vld [vmem:[%s5389_s3 + $0x8] sm:$0xff] (!%p197_p2)  ;;  %v4711_v14 = vld [vmem:[%s5389_s3 + $0x10] sm:$0xff] (!%p197_p2)  ;;  %v4716_v15 = vld [vmem:[%s5389_s3] sm:$0xff] (!%p197_p2) }
   0x6   : > { %200 = sbr.rel (%p197_p2) target bundleno = 3124 (0xc34), region = 40  ;;  %4535 = vset.pattern.permute.xlu1 (!%p197_p2), %v4633_v0  ;;  %4534 = vset.pattern.permute.xlu0 (!%p197_p2), %v4633_v0  ;;  %v4723_v16 = vld [vmem:[%s5389_s3 + $0x18] sm:$0xff] (!%p197_p2)  ;;  %vm372_vm1 = vcmask (!%p197_p2), 195584   ;;  %s4634_s7 = smov (!%p197_p2), 127   ;;  %vm350_vm2 = vcmask (!%p197_p2), 7168   ;;  %vm4636_vm4 = vmmov (!%p197_p2), 1  }
   0x7   : > { %4226 = vmatprep.mubr.msk.f32.mxu1 (!%p197_p2), %vm372_vm1, %v4716_v15  ;;  %4214 = vmatprep.mubr.msk.f32.mxu0 (!%p197_p2), %vm372_vm1, %v4716_v15  ;;  %s4635_s8 = smov (!%p197_p2), 1   ;;  %vm4017_vm3 = vmneg (!%p197_p2), %vm350_vm2  ;;  %vm367_vm6 = vcmask (!%p197_p2), 121856   ;;  %v4637_v62 = vmov (!%p197_p2), 3   ;;  %s4638_s9 = smov (!%p197_p2), 16   ;;  %vm773_vm7 = vcmask (!%p197_p2), 261120   ;;  %vm778_vm8 = vcmask (!%p197_p2), 392192  }
   0x8   : > { %vm4731_vm5 = vmpackc.low (!%p197_p2), %vm4636_vm4, %vm4017_vm3  ;;  %s4639_s10 = smov (!%p197_p2), 32   ;;  %s4640_s11 = smov (!%p197_p2), 48  }
   0x9   : > { %s4647_s17 = smov (!%p197_p2), 112   ;;  %s4648_s28 = smov (!%p197_p2), 96  }
   0xa   : > { %s4649_s29 = smov (!%p197_p2), 80  }
   0xd   : > { %s5395_s19 = smov (!%p228_p3, %s4007_s19), 1 }
   0xe   : > { %s4122_s20 = sshll.u32 %s5395_s19, 5  ;;  %s4123_s27 = sshll.u32 %s5395_s19, 6 }
   0xf   : > { %s232_s23 = scalar_lea.vmem %s5386_s0, %s4122_s20  ;;  %s5159_s30 = scalar_lea.vmem %s5391_s5, %s4123_s27 }
  0x10   : > { %v4694_v1 = vld [vmem:[%s232_s23 + $0x10] sm:$0xff]  ;;  %v272_v2 = vld [vmem:[%s232_s23] sm:$0xff]  ;;  %v275_v3 = vld [vmem:[%s232_s23 + $0x18] sm:$0xff] }
  0x11   : > { %v278_v4 = vmul.f32 %v4694_v1, %v4694_v1  ;;  %v276_v5 = vmul.f32 %v272_v2, %v272_v2  ;;  %v279_v6 = vmul.f32 %v275_v3, %v275_v3  ;;  %v273_v7 = vld [vmem:[%s232_s23 + $0x8] sm:$0xff]  ;;  %s4014_s23 = sshll.u32 %s5395_s19, 2 }
  0x12   : > { %v277_v8 = vmul.f32 %v273_v7, %v273_v7  ;;  %s5152_s26 = scalar_lea.vmem %s5387_s1, %s4014_s23 }
  0x13   : > { %v287_v9 = vsel %vm280_vm0, %v278_v4, 0.0  ;;  %v281_v10 = vsel %vm280_vm0, %v276_v5, 0.0  ;;  %v290_v11 = vsel %vm280_vm0, %v279_v6, 0.0 }
  0x14   : > { %288 = vadd.xlane.f32.xlu1 %v287_v9  ;;  %282 = vadd.xlane.f32.xlu0 %v281_v10  ;;  %v284_v12 = vsel %vm280_vm0, %v277_v8, 0.0 }
  0x18   : > { %291 = vadd.xlane.f32.xlu1 %v290_v11  ;;  %285 = vadd.xlane.f32.xlu0 %v284_v12  ;;  %v261_v11 = vld [vmem:[%s5388_s2 + $0x98] sm:$0xff]  ;;  %v260_v12 = vld [vmem:[%s5388_s2 + $0x48] sm:$0xff] }
  0x29   : > { %317 = vperm.xlu1 %4535, %v4705_v13  }
  0x2d   : > { %322 = vperm.xlu1 %4535, %v4711_v14  }
  0x2e   : > { %312 = vperm.xlu0 %4534, %v4716_v15  }
  0x31   : > { %327 = vperm.xlu1 %4535, %v4723_v16  }
  0x32   : > { %4547 = vset.pattern.permute.xlu0 %v4637_v62 }
  0x35   : > { %4546 = vset.pattern.permute.xlu1 %v4637_v62 }
  0xa1   : > { %v289_v17 = vpop.xlane.xlu1 %288  ;;  %v283_v18 = vpop.xlane.xlu0 %282 }
  0xa2   : > { %v294_v19 = vmul.f32 0.0625, %v283_v18  ;;  %v296_v27 = vmul.f32 0.0625, %v289_v17 }
  0xa4   : > { %v298_v20 = vadd.f32 1e-05, %v294_v19  ;;  %v300_v29 = vadd.f32 1e-05, %v296_v27 }
  0xa5   : > { %v292_v21 = vpop.xlane.xlu1 %291  ;;  %v286_v22 = vpop.xlane.xlu0 %285 }
  0xa6   : > { %v297_v23 = vmul.f32 0.0625, %v292_v21  ;;  %v295_v24 = vmul.f32 0.0625, %v286_v22  ;;  %4556 = vrsqrt.f32 %v298_v20  ;;  %v4644_v20 = vmov 5  }
  0xa7   : > { %v4645_v21 = vmov 2  }
  0xa8   : > { %v301_v25 = vadd.f32 1e-05, %v297_v23  ;;  %v299_v26 = vadd.f32 1e-05, %v295_v24 }
  0xa9   : > { %v318_v28 = vpop.permute.xlu1 %317 }
  0xaa   : > { %4558 = vrsqrt.f32 %v301_v25 }
  0xab   : > { %4560 = vrsqrt.f32 %v299_v26 }
  0xac   : > { %4562 = vrsqrt.f32 %v300_v29 }
  0xad   : > { %v323_v30 = vpop.permute.xlu1 %322  ;;  %v313_v36 = vpop.permute.xlu0 %312 }
  0xb0   : > { %v4557_v31 = vpop.eup %4556 }
  0xb1   : > { %v306_v33 = vmul.f32 %v4557_v31, %v272_v2  ;;  %v328_v34 = vpop.permute.xlu1 %327 }
  0xb3   : > { %v330_v41 = vmul.f32 %v313_v36, %v306_v33 }
  0xb4   : > { %v4559_v32 = vpop.eup %4558 }
  0xb5   : > { %v4561_v35 = vpop.eup %4560  ;;  %v309_v37 = vmul.f32 %v4559_v32, %v275_v3 }
  0xb6   : > { %v307_v38 = vmul.f32 %v4561_v35, %v273_v7  ;;  %v4563_v43 = vpop.eup %4562 }
  0xb7   : > { %v333_v39 = vmul.f32 %v328_v34, %v309_v37  ;;  %v308_v44 = vmul.f32 %v4563_v43, %v4694_v1  ;;  %v266_v34 = vld [vmem:[%s5390_s4] sm:$0xff] }
  0xb8   : > { %v331_v40 = vmul.f32 %v318_v28, %v307_v38 }
  0xb9   : > { %361 = vrot.lane.b32.xlu0 %v333_v39, %s4634_s7  ;;  %v332_v45 = vmul.f32 %v323_v30, %v308_v44 }
  0xba   : > { %v4536_v42 = vpack.i.bf16 %v331_v40, %v330_v41 }
  0xbb   : > { %v4541_v46 = vpack.i.bf16 %v333_v39, %v332_v45 }
  0xbc   : > { %4537 = vrot.lane.b32.xlu1 %v4536_v42, %s4635_s8 }
  0xc0   : > { %355 = vrot.lane.b32.xlu1 %v330_v41, %s4634_s7 }
  0xc4   : > { %357 = vrot.lane.b32.xlu1 %v331_v40, %s4634_s7 }
  0xc8   : > { %4542 = vrot.lane.b32.xlu1 %v4541_v46, %s4635_s8 }
  0xcc   : > { %359 = vrot.lane.b32.xlu1 %v332_v45, %s4634_s7 }
 0x12b   : > { %v362_v60 = vpop.permute.xlu0 %361 }
 0x12e   : > { %v4538_v47 = vpop.permute.xlu1 %4537 }
 0x12f   : > { %v4540_v48 = vunpack.i.h.bf16 %v4538_v47  ;;  %v4539_v49 = vunpack.i.l.bf16 %v4538_v47 }
 0x131   : > { %v4353_v51 = vpack.c.bf16 %v330_v41, %v4539_v49  ;;  %v4359_v52 = vpack.c.bf16 %v331_v40, %v4540_v48 }
 0x132   : > { %v356_v53 = vpop.permute.xlu1 %355 }
 0x133   : > { %4355 = vmatprep.subr.msk.bf16.mxu0 %vm4731_vm5, %v4353_v51  ;;  %4361 = vmatprep.subr.msk.bf16.mxu1 %vm4731_vm5, %v4359_v52 }
 0x134   : > { %4358 = vmatpush3.bf16.msk.msra.mxu0 %vm4731_vm5, %v4353_v51  ;;  %4364 = vmatpush3.bf16.msk.msra.mxu1 %vm4731_vm5, %v4359_v52 }
 0x135   : > { %4212 = vmatprep.subr.msk.mxu0 %vm367_vm6, %v356_v53 }
 0x136   : > { %v358_v54 = vpop.permute.xlu1 %357 }
 0x137   : > { %4224 = vmatprep.subr.msk.mxu1 %vm367_vm6, %v358_v54 }
 0x138   : > { %4213 = vmatpush3.msk.msra.mxu0 %vm367_vm6, %v356_v53  ;;  %4225 = vmatpush3.msk.msra.mxu1 %vm367_vm6, %v358_v54 }
 0x139   : > { %4227 = vmatmul.mubr.msk.f32.vlgmr.msra.gmra.mrb[0].mxu1 %vm372_vm1, %v4705_v13  ;;  %4215 = vmatmul.mubr.msk.f32.vlgmr.msra.gmra.mrb[0].mxu0 %vm372_vm1, %v4705_v13 }
 0x13a   : > { %v4543_v55 = vpop.permute.xlu1 %4542  ;;  %4217 = vmatprep.mubr.msk.f32.mxu0 %vm372_vm1, %v4711_v14  ;;  %4229 = vmatprep.mubr.msk.f32.mxu1 %vm372_vm1, %v4711_v14 }
 0x13b   : > { %v4545_v56 = vunpack.i.h.bf16 %v4543_v55  ;;  %v4544_v57 = vunpack.i.l.bf16 %v4543_v55 }
 0x13d   : > { %v4371_v58 = vpack.c.bf16 %v333_v39, %v4545_v56  ;;  %v4365_v59 = vpack.c.bf16 %v332_v45, %v4544_v57  ;;  %4218 = vmatmul.mubr.msk.f32.gmra.mrb[2].mxu0 %vm372_vm1, %v4723_v16  ;;  %4230 = vmatmul.mubr.msk.f32.gmra.mrb[2].mxu1 %vm372_vm1, %v4723_v16 }
 0x13e   : > { %4238 = vmatprep.mubr.msk.f32.mxu0 %vm372_vm1, %v4716_v15  ;;  %4250 = vmatprep.mubr.msk.f32.mxu1 %vm372_vm1, %v4716_v15  ;;  %v360_v61 = vpop.permute.xlu1 %359  ;;  %v4643_v15 = vmov 1  }
 0x13f   : > { %4367 = vmatprep.subr.msk.bf16.mxu0 %vm4731_vm5, %v4365_v59  ;;  %4373 = vmatprep.subr.msk.bf16.mxu1 %vm4731_vm5, %v4371_v58 }
 0x140   : > { %4370 = vmatpush3.bf16.msk.msra.mxu0 %vm4731_vm5, %v4365_v59  ;;  %4376 = vmatpush3.bf16.msk.msra.mxu1 %vm4731_vm5, %v4371_v58 }
 0x141   : > { %4236 = vmatprep.subr.msk.mxu0 %vm367_vm6, %v360_v61  ;;  %4248 = vmatprep.subr.msk.mxu1 %vm367_vm6, %v362_v60 }
 0x144   : > { %4237 = vmatpush3.msk.msra.mxu0 %vm367_vm6, %v360_v61  ;;  %4249 = vmatpush3.msk.msra.mxu1 %vm367_vm6, %v362_v60 }
 0x145   : > { %4239 = vmatmul.mubr.msk.f32.vlgmr.msra.gmra.mrb[4].mxu0 %vm372_vm1, %v4705_v13  ;;  %4251 = vmatmul.mubr.msk.f32.vlgmr.msra.gmra.mrb[4].mxu1 %vm372_vm1, %v4705_v13  ;;  %v4641_v13 = vmov 0  }
 0x146   : > { %4241 = vmatprep.mubr.msk.f32.mxu0 %vm372_vm1, %v4711_v14  ;;  %4253 = vmatprep.mubr.msk.f32.mxu1 %vm372_vm1, %v4711_v14  ;;  %v4642_v14 = vmov 4  }
 0x149   : > { %4242 = vmatmul.mubr.msk.f32.gmra.mrb[6].mxu0 %vm372_vm1, %v4723_v16  ;;  %4254 = vmatmul.mubr.msk.f32.gmra.mrb[6].mxu1 %vm372_vm1, %v4723_v16 }
 0x14a   : > { %4260 = vmatprep.mubr.msk.f32.mxu0 %vm280_vm0, %v266_v34 }
 0x20c   : > { %v4228_v63 = vpop.f32.mrb[0].mxu1  ;;  %v4216_v0 = vpop.f32.mrb[0].mxu0 }
 0x20d   : > { %727 = vrot.lane.b32.xlu0 %v4228_v63, %s4638_s9  ;;  %v532_v1 = vpop.f32.mrb[1].mxu1  ;;  %v447_v2 = vpop.f32.mrb[1].mxu0 }
 0x20e   : > { %725 = vrot.lane.b32.xlu1 %v532_v1, %s4638_s9 }
 0x210   : > { %v4789_v3 = vpop.f32.mrb[2].mxu0  ;;  %v4791_v4 = vpop.f32.mrb[2].mxu1 }
 0x211   : > { %v4793_v5 = vpop.f32.mrb[3].mxu0  ;;  %v542_v6 = vpop.f32.mrb[3].mxu1 }
 0x218   : > { %v4240_v7 = vpop.f32.mrb[4].mxu0  ;;  %v4252_v8 = vpop.f32.mrb[4].mxu1 }
 0x219   : > { %743 = vrot.lane.b32.xlu0 %v4240_v7, %s4639_s10  ;;  %v617_v9 = vpop.f32.mrb[5].mxu0  ;;  %v702_v10 = vpop.f32.mrb[5].mxu1 }
 0x21a   : > { %741 = vrot.lane.b32.xlu1 %v617_v9, %s4639_s10 }
 0x21c   : > { %v4243_v16 = vpop.f32.mrb[6].mxu0  ;;  %v4255_v17 = vpop.f32.mrb[6].mxu1 }
 0x21d   : > { %759 = vrot.lane.b32.xlu0 %v4252_v8, %s4640_s11  ;;  %v627_v18 = vpop.f32.mrb[7].mxu0  ;;  %v712_v19 = vpop.f32.mrb[7].mxu1 }
 0x21e   : > { %757 = vrot.lane.b32.xlu1 %v702_v10, %s4640_s11 }
 0x221   : > { %790 = vperm.xlu0 %4547, %v261_v11  }
 0x222   : > { %785 = vperm.xlu1 %4546, %v260_v12  }
 0x225   : > { %4549 = vset.pattern.permute.xlu0 %v4641_v13 }
 0x226   : > { %4548 = vset.pattern.permute.xlu1 %v4642_v14  ;;  %816 = vperm.xlu0 %4549, %v260_v12  }
 0x227   : > { %796 = vperm.xlu1 %4548, %v260_v12  }
 0x22a   : > { %4552 = vset.pattern.permute.xlu0 %v4643_v15 }
 0x22b   : > { %800 = vperm.xlu1 %4548, %v261_v11   ;;  %840 = vperm.xlu0 %4552, %v261_v11  }
 0x22f   : > { %4550 = vset.pattern.permute.xlu1 %v4641_v13  ;;  %4554 = vset.pattern.permute.xlu0 %v4644_v20 }
 0x230   : > { %820 = vperm.xlu1 %4550, %v261_v11  }
 0x234   : > { %4551 = vset.pattern.permute.xlu1 %v4643_v15 }
 0x235   : > { %836 = vperm.xlu1 %4551, %v260_v12  }
 0x239   : > { %4553 = vset.pattern.permute.xlu1 %v4645_v21 }
 0x23a   : > { %856 = vperm.xlu1 %4553, %v260_v12  }
 0x23e   : > { %860 = vperm.xlu1 %4553, %v261_v11  }
 0x242   : > { %4555 = vset.pattern.permute.xlu1 %v4644_v20 }
 0x27f   : > { %v728_v22 = vpop.permute.xlu0 %727 }
 0x280   : > { %v726_v23 = vpop.permute.xlu1 %725  ;;  %v770_v26 = vsel %vm280_vm0, %v4216_v0, %v728_v22 }
 0x281   : > { %v769_v27 = vsel %vm280_vm0, %v447_v2, %v726_v23 }
 0x28b   : > { %v744_v24 = vpop.permute.xlu0 %743 }
 0x28c   : > { %v742_v25 = vpop.permute.xlu1 %741  ;;  %v775_v28 = vsel %vm773_vm7, %v770_v26, %v744_v24  ;;  %v267_v24 = vld [vmem:[%s5390_s4 + $0x8] sm:$0xff]  ;;  %v269_v26 = vld [vmem:[%s5390_s4 + $0x18] sm:$0xff] }
 0x28d   : > { %v774_v30 = vsel %vm773_vm7, %v769_v27, %v742_v25  ;;  %v268_v25 = vld [vmem:[%s5390_s4 + $0x10] sm:$0xff]  ;;  %v270_v27 = vld [vmem:[%s5390_s4 + $0x20] sm:$0xff] }
 0x28f   : > { %v760_v29 = vpop.permute.xlu0 %759 }
 0x290   : > { %v780_v31 = vsel %vm778_vm8, %v775_v28, %v760_v29  ;;  %v758_v32 = vpop.permute.xlu1 %757  ;;  %v271_v28 = vld [vmem:[%s5390_s4 + $0x28] sm:$0xff]  ;;  %v4863_v29 = vld [vmem:[%s5388_s2 + $0x18] sm:$0xff] }
 0x291   : > { %v779_v33 = vsel %vm778_vm8, %v774_v30, %v758_v32  ;;  %809 = vrot.lane.b32.xlu1 %v780_v31, %s4640_s11  ;;  %v4868_v30 = vld [vmem:[%s5388_s2 + $0x68] sm:$0xff]  ;;  %v4877_v32 = vld [vmem:[%s5388_s2 + $0x10] sm:$0xff] }
 0x292   : > { %807 = vrot.lane.b32.xlu0 %v779_v33, %s4640_s11 }
 0x295   : > { %829 = vrot.lane.b32.xlu1 %v780_v31, %s4639_s10 }
 0x296   : > { %827 = vrot.lane.b32.xlu0 %v779_v33, %s4639_s10 }
 0x299   : > { %849 = vrot.lane.b32.xlu1 %v780_v31, %s4638_s9 }
 0x29a   : > { %847 = vrot.lane.b32.xlu0 %v779_v33, %s4638_s9 }
 0x29d   : > { %1009 = vperm.xlu1 %4555, %v261_v11  }
 0x29e   : > { %1005 = vperm.xlu0 %4554, %v260_v12  }
 0x2a0   : > { %v791_v40 = vpop.permute.xlu0 %790 }
 0x2a1   : > { %729 = vrot.lane.b32.xlu1 %v542_v6, %s4638_s9  ;;  %v786_v35 = vpop.permute.xlu1 %785  ;;  %v794_v49 = vmul.f32 %v791_v40, %v780_v31  ;;  %v4872_v31 = vpack.c.bf16 %v4868_v30, %v4863_v29 }
 0x2a2   : > { %731 = vrot.lane.b32.xlu0 %v4791_v4, %s4638_s9  ;;  %v793_v52 = vmul.f32 %v786_v35, %v779_v33  ;;  %v4882_v33 = vld [vmem:[%s5388_s2 + $0x60] sm:$0xff]  ;;  %v4646_v35 = vmov 0.0  }
 0x2a3   : > { %v4886_v34 = vpack.c.bf16 %v4882_v33, %v4877_v32  ;;  %4382 = vmatprep.subr.bf16.mxu1 %v4872_v31  ;;  %1102 = vmatprep.mubr.f32.mxu1 %v4646_v35 }
 0x2a5   : > { %745 = vrot.lane.b32.xlu1 %v627_v18, %s4639_s10  ;;  %v817_v41 = vpop.permute.xlu0 %816  ;;  %4384 = vmatpush1.bf16.msra.mxu1 %v4886_v34 }
 0x2a6   : > { %747 = vrot.lane.b32.xlu0 %v4243_v16, %s4639_s10  ;;  %v797_v36 = vpop.permute.xlu1 %796  ;;  %4386 = vmatprep.subr.bf16.mxu1 %v4872_v31 }
 0x2a7   : > { %v803_v59 = vadd.f32 %v797_v36, %v793_v52 }
 0x2a9   : > { %761 = vrot.lane.b32.xlu1 %v712_v19, %s4640_s11 }
 0x2aa   : > { %763 = vrot.lane.b32.xlu0 %v4255_v17, %s4640_s11  ;;  %v801_v37 = vpop.permute.xlu1 %800  ;;  %v841_v43 = vpop.permute.xlu0 %840 }
 0x2ab   : > { %v804_v56 = vadd.f32 %v801_v37, %v794_v49 }
 0x2af   : > { %v821_v38 = vpop.permute.xlu1 %820 }
 0x2b4   : > { %v837_v39 = vpop.permute.xlu1 %836 }
 0x2b9   : > { %v857_v42 = vpop.permute.xlu1 %856 }
 0x2bd   : > { %v861_v44 = vpop.permute.xlu1 %860 }
 0x303   : > { %v810_v45 = vpop.permute.xlu1 %809 }
 0x304   : > { %v814_v46 = vsel %vm778_vm8, 0.0, %v810_v45  ;;  %v808_v47 = vpop.permute.xlu0 %807 }
 0x305   : > { %v813_v48 = vsel %vm778_vm8, 0.0, %v808_v47  ;;  %v824_v50 = vmul.f32 %v821_v38, %v814_v46 }
 0x306   : > { %v823_v53 = vmul.f32 %v817_v41, %v813_v48 }
 0x307   : > { %v830_v51 = vpop.permute.xlu1 %829  ;;  %v826_v61 = vadd.f32 %v824_v50, %v804_v56 }
 0x308   : > { %v834_v54 = vsel %vm773_vm7, 0.0, %v830_v51  ;;  %v828_v55 = vpop.permute.xlu0 %827  ;;  %v825_v63 = vadd.f32 %v823_v53, %v803_v59 }
 0x309   : > { %v844_v57 = vmul.f32 %v841_v43, %v834_v54  ;;  %v833_v58 = vsel %vm773_vm7, 0.0, %v828_v55 }
 0x30a   : > { %v843_v60 = vmul.f32 %v837_v39, %v833_v58 }
 0x30b   : > { %v850_v62 = vpop.permute.xlu1 %849  ;;  %v846_v2 = vadd.f32 %v844_v57, %v826_v61 }
 0x30c   : > { %v854_v0 = vsel %vm280_vm0, 0.0, %v850_v62  ;;  %v848_v1 = vpop.permute.xlu0 %847  ;;  %v845_v7 = vadd.f32 %v843_v60, %v825_v63 }
 0x30d   : > { %v864_v4 = vmul.f32 %v861_v44, %v854_v0  ;;  %v853_v6 = vsel %vm280_vm0, 0.0, %v848_v1 }
 0x30e   : > { %v863_v8 = vmul.f32 %v857_v42, %v853_v6 }
 0x30f   : > { %v866_v9 = vadd.f32 %v864_v4, %v846_v2 }
 0x310   : > { %v865_v10 = vadd.f32 %v863_v8, %v845_v7 }
 0x311   : > { %v868_v11 = vsub.f32 0.0, %v866_v9 }
 0x312   : > { %v867_v12 = vsub.f32 0.0, %v865_v10 }
 0x313   : > { %v871_v13 = vmul.f32 1.442695, %v868_v11 }
 0x314   : > { %v869_v14 = vmul.f32 1.442695, %v867_v12 }
 0x315   : > { %4564 = vpow2.f32 %v871_v13 }
 0x316   : > { %4566 = vpow2.f32 %v869_v14  ;;  %v4923_v14 = vld [vmem:[%s5388_s2 + $0x28] sm:$0xff] }
 0x31c   : > { %v1010_v36 = vpop.permute.xlu1 %1009 }
 0x31d   : > { %v1006_v37 = vpop.permute.xlu0 %1005 }
 0x31f   : > { %v4565_v15 = vpop.eup %4564 }
 0x320   : > { %v4567_v16 = vpop.eup %4566  ;;  %v874_v17 = vadd.f32 1.0, %v4565_v15  ;;  %v730_v38 = vpop.permute.xlu1 %729  ;;  %v4928_v15 = vld [vmem:[%s5388_s2 + $0x78] sm:$0xff] }
 0x321   : > { %v873_v18 = vadd.f32 1.0, %v4567_v16  ;;  %v732_v39 = vpop.permute.xlu0 %731  ;;  %v771_v53 = vsel %vm280_vm0, %v4793_v5, %v730_v38 }
 0x322   : > { %4568 = vrcp.f32 %v874_v17  ;;  %v772_v56 = vsel %vm280_vm0, %v4789_v3, %v732_v39 }
 0x323   : > { %4570 = vrcp.f32 %v873_v18 }
 0x324   : > { %v746_v40 = vpop.permute.xlu1 %745 }
 0x325   : > { %v748_v42 = vpop.permute.xlu0 %747  ;;  %v776_v57 = vsel %vm773_vm7, %v771_v53, %v746_v40 }
 0x326   : > { %v777_v60 = vsel %vm773_vm7, %v772_v56, %v748_v42 }
 0x328   : > { %v762_v51 = vpop.permute.xlu1 %761 }
 0x329   : > { %v764_v54 = vpop.permute.xlu0 %763  ;;  %v4911_v61 = vsel %vm778_vm8, %v776_v57, %v762_v51 }
 0x32a   : > { %v782_v5 = vsel %vm778_vm8, %v777_v60, %v764_v54  ;;  %v879_v3 = vsub.f32 0.0, %v4911_v61 }
 0x32b   : > { %v880_v63 = vsub.f32 0.0, %v782_v5 }
 0x32c   : > { %v4569_v19 = vpop.eup %4568  ;;  %v881_v0 = vmul.f32 1.442695, %v879_v3 }
 0x32d   : > { %v4571_v20 = vpop.eup %4570  ;;  %v4834_v21 = vmul.f32 %v4569_v19, %v866_v9  ;;  %v883_v1 = vmul.f32 1.442695, %v880_v63  ;;  %v5026_v63 = vld [vmem:[%s5388_s2 + $0x50] sm:$0xff] }
 0x32e   : > { %v4836_v22 = vmul.f32 %v4571_v20, %v865_v10 }
 0x330   : > { %v4377_v23 = vpack.c.bf16 %v4834_v21, %v4836_v22 }
 0x332   : > { %4378 = vmatprep.subr.bf16.mxu0 %v4377_v23 }
 0x333   : > { %4380 = vmatpush3.bf16.msra.mxu0 %v4377_v23 }
 0x334   : > { %4390 = vmatprep.subr.bf16.mxu0 %v4872_v31 }
 0x336   : > { %4261 = vmatmul.mubr.msk.f32.vlgmr.msra.gmra.mrb[8].mxu0 %vm280_vm0, %v267_v24  ;;  %v4932_v24 = vpack.c.bf16 %v4928_v15, %v4923_v14 }
 0x337   : > { %4263 = vmatprep.mubr.msk.f32.mxu0 %vm280_vm0, %v268_v25  ;;  %4392 = vmatpush1.bf16.msra.mxu0 %v4886_v34  ;;  %v4943_v25 = vld [vmem:[%s5388_s2 + $0x20] sm:$0xff] }
 0x33a   : > { %4264 = vmatmul.mubr.msk.f32.gmra.mrb[10].mxu0 %vm280_vm0, %v269_v26  ;;  %v4948_v26 = vld [vmem:[%s5388_s2 + $0x70] sm:$0xff] }
 0x33b   : > { %4266 = vmatprep.mubr.msk.f32.mxu0 %vm280_vm0, %v270_v27  ;;  %v258_v27 = vld [vmem:[%s5388_s2 + $0x40] sm:$0xff] }
 0x33e   : > { %4267 = vmatmul.mubr.msk.f32.gmra.mrb[12].mxu0 %vm280_vm0, %v271_v28  ;;  %v259_v28 = vld [vmem:[%s5388_s2 + $0x90] sm:$0xff] }
 0x33f   : > { %1268 = vmatprep.mubr.f32.mxu0 %v4646_v35 }
 0x409   : > { %v4262_v41 = vpop.f32.mrb[8].mxu0 }
 0x40a   : > { %v1013_v43 = vadd.f32 %v4262_v41, %v1010_v36  ;;  %v975_v44 = vpop.f32.mrb[9].mxu0  ;;  %v4964_v36 = vpack.c.bf16 %v4948_v26, %v4943_v25 }
 0x40b   : > { %v1012_v45 = vadd.f32 %v1006_v37, %v975_v44  ;;  %v4966_v37 = vpack.c.bf16 %v259_v28, %v258_v27 }
 0x40c   : > { %v1017_v46 = vand.u32 2147483647, %v1013_v43  ;;  %v1015_v12 = vmax.f32 %v1013_v43, 0.0 }
 0x40d   : > { %v1016_v47 = vand.u32 2147483647, %v1012_v45  ;;  %v4895_v48 = vpop.f32.mrb[10].mxu0  ;;  %v1014_v17 = vmax.f32 %v1012_v45, 0.0 }
 0x40e   : > { %v1019_v49 = vsub.f32 0.0, %v1017_v46  ;;  %v4897_v50 = vpop.f32.mrb[11].mxu0 }
 0x40f   : > { %v1018_v52 = vsub.f32 0.0, %v1016_v47  ;;  %4055 = vmatmul.mubr.msk.f32.vlgmr.msra.gmra.mrb[14].mxu0 %vm280_vm0, %v4897_v50 }
 0x410   : > { %v1022_v55 = vmul.f32 1.442695, %v1019_v49  ;;  %1274 = vmatprep.mubr.f32.mxu0 %v4646_v35 }
 0x411   : > { %v1020_v58 = vmul.f32 1.442695, %v1018_v52  ;;  %v4907_v59 = vpop.f32.mrb[12].mxu0 }
 0x412   : > { %4572 = vpow2.f32 %v1022_v55  ;;  %v4913_v62 = vpop.f32.mrb[13].mxu0 }
 0x413   : > { %4574 = vpow2.f32 %v1020_v58  ;;  %4056 = vmatmul.mubr.msk.f32.gmra.mrb[16].mxu0 %vm280_vm0, %v4895_v48  ;;  %v5014_v58 = vld [vmem:[%s5388_s2] sm:$0xff] }
 0x414   : > { %1478 = vmatprep.mubr.f32.mxu0 %v4863_v29  ;;  %4576 = vpow2.f32 %v881_v0 }
 0x415   : > { %4578 = vpow2.f32 %v883_v1 }
 0x41c   : > { %v4573_v2 = vpop.eup %4572 }
 0x41d   : > { %v4575_v4 = vpop.eup %4574  ;;  %v1025_v6 = vadd.f32 1.0, %v4573_v2  ;;  %v5031_v2 = vld [vmem:[%s5388_s2 + $0x58] sm:$0xff] }
 0x41e   : > { %v1024_v7 = vadd.f32 1.0, %v4575_v4  ;;  %v4577_v8 = vpop.eup %4576 }
 0x41f   : > { %4580 = vlog2.f32 %v1025_v6  ;;  %v4579_v9 = vpop.eup %4578  ;;  %v885_v19 = vadd.f32 1.0, %v4577_v8 }
 0x420   : > { %4582 = vlog2.f32 %v1024_v7  ;;  %v886_v16 = vadd.f32 1.0, %v4579_v9 }
 0x422   : > { %4584 = vrcp.f32 %v886_v16 }
 0x423   : > { %4586 = vrcp.f32 %v885_v19 }
 0x429   : > { %v4581_v10 = vpop.eup %4580 }
 0x42a   : > { %v4583_v11 = vpop.eup %4582  ;;  %v1029_v13 = vmul.f32 0.6931472, %v4581_v10 }
 0x42b   : > { %v1027_v18 = vmul.f32 0.6931472, %v4583_v11 }
 0x42c   : > { %v1031_v20 = vadd.f32 %v1029_v13, %v1015_v12  ;;  %v4585_v38 = vpop.eup %4584 }
 0x42d   : > { %v1030_v23 = vadd.f32 %v1027_v18, %v1014_v17  ;;  %v4587_v39 = vpop.eup %4586  ;;  %v890_v40 = vmul.f32 %v4585_v38, %v782_v5 }
 0x42e   : > { %1752 = vrot.lane.b32.xlu0 %v1031_v20, %s4647_s17  ;;  %v889_v41 = vmul.f32 %v4587_v39, %v4911_v61 }
 0x42f   : > { %1750 = vrot.lane.b32.xlu1 %v1030_v23, %s4647_s17  ;;  %4051 = vmatmul.mubr.msk.f32.vlgmr.msra.gmra.mrb[8].mxu1 %vm280_vm0, %v1030_v23 }
 0x430   : > { %1108 = vmatprep.mubr.f32.mxu1 %v4646_v35  ;;  %4388 = vmatpush1.bf16.msra.mxu1 %v4886_v34 }
 0x431   : > { %4394 = vmatprep.subr.bf16.mxu1 %v4932_v24 }
 0x432   : > { %1922 = vrot.lane.b32.xlu0 %v4895_v48, %s4647_s17 }
 0x433   : > { %1920 = vrot.lane.b32.xlu1 %v4897_v50, %s4647_s17  ;;  %4052 = vmatmul.mubr.msk.f32.gmra.mrb[10].mxu1 %vm280_vm0, %v1031_v20 }
 0x434   : > { %1185 = vmatprep.mubr.f32.mxu1 %v4646_v35 }
 0x436   : > { %1837 = vrot.lane.b32.xlu0 %v4834_v21, %s4647_s17 }
 0x437   : > { %1835 = vrot.lane.b32.xlu1 %v4836_v22, %s4647_s17  ;;  %4053 = vmatmul.mubr.msk.f32.vlgmr.msra.gmra.mrb[12].mxu1 %vm280_vm0, %v4836_v22 }
 0x438   : > { %1191 = vmatprep.mubr.f32.mxu1 %v4646_v35  ;;  %4396 = vmatpush1.bf16.msra.mxu1 %v4964_v36 }
 0x439   : > { %4402 = vmatprep.subr.bf16.mxu1 %v4966_v37 }
 0x43a   : > { %2053 = vrot.lane.b32.xlu0 %v4907_v59, %s4647_s17 }
 0x43b   : > { %2051 = vrot.lane.b32.xlu1 %v4913_v62, %s4647_s17  ;;  %4054 = vmatmul.mubr.msk.f32.gmra.mrb[14].mxu1 %vm280_vm0, %v4834_v21 }
 0x43c   : > { %1397 = vmatprep.mubr.f32.mxu1 %v4646_v35 }
 0x43e   : > { %2217 = vrot.lane.b32.xlu0 %v890_v40, %s4647_s17 }
 0x43f   : > { %2215 = vrot.lane.b32.xlu1 %v889_v41, %s4647_s17  ;;  %4057 = vmatmul.mubr.msk.f32.vlgmr.msra.gmra.mrb[16].mxu1 %vm280_vm0, %v4913_v62 }
 0x440   : > { %1403 = vmatprep.mubr.f32.mxu1 %v4646_v35  ;;  %4404 = vmatpush3.bf16.msra.mxu1 %v4966_v37 }
 0x442   : > { %2482 = vrot.lane.b32.xlu0 %v1031_v20, %s4648_s28 }
 0x443   : > { %2480 = vrot.lane.b32.xlu1 %v1030_v23, %s4648_s28  ;;  %4058 = vmatmul.mubr.msk.f32.gmra.mrb[18].mxu1 %vm280_vm0, %v4907_v59 }
 0x444   : > { %4273 = vmatprep.mubr.msk.f32.mxu1 %vm280_vm0, %v889_v41 }
 0x446   : > { %2652 = vrot.lane.b32.xlu0 %v4895_v48, %s4648_s28 }
 0x447   : > { %2650 = vrot.lane.b32.xlu1 %v4897_v50, %s4648_s28  ;;  %4274 = vmatmul.mubr.msk.f32.vlgmr.msra.gmra.mrb[20].mxu1 %vm280_vm0, %v890_v40 }
 0x44a   : > { %2567 = vrot.lane.b32.xlu0 %v4834_v21, %s4648_s28 }
 0x44b   : > { %2565 = vrot.lane.b32.xlu1 %v4836_v22, %s4648_s28 }
 0x44e   : > { %2783 = vrot.lane.b32.xlu0 %v4907_v59, %s4648_s28 }
 0x44f   : > { %2781 = vrot.lane.b32.xlu1 %v4913_v62, %s4648_s28 }
 0x452   : > { %2947 = vrot.lane.b32.xlu0 %v890_v40, %s4648_s28 }
 0x453   : > { %2945 = vrot.lane.b32.xlu1 %v889_v41, %s4648_s28 }
 0x456   : > { %3212 = vrot.lane.b32.xlu0 %v1031_v20, %s4649_s29 }
 0x457   : > { %3210 = vrot.lane.b32.xlu1 %v1030_v23, %s4649_s29 }
 0x45a   : > { %3382 = vrot.lane.b32.xlu0 %v4895_v48, %s4649_s29 }
 0x45b   : > { %3380 = vrot.lane.b32.xlu1 %v4897_v50, %s4649_s29 }
 0x45e   : > { %3297 = vrot.lane.b32.xlu0 %v4834_v21, %s4649_s29 }
 0x45f   : > { %3295 = vrot.lane.b32.xlu1 %v4836_v22, %s4649_s29 }
 0x462   : > { %3513 = vrot.lane.b32.xlu0 %v4907_v59, %s4649_s29  ;;  %v5019_v59 = vld [vmem:[%s5388_s2 + $0x8] sm:$0xff] }
 0x463   : > { %3511 = vrot.lane.b32.xlu1 %v4913_v62, %s4649_s29 }
 0x466   : > { %3677 = vrot.lane.b32.xlu0 %v890_v40, %s4649_s29 }
 0x467   : > { %3675 = vrot.lane.b32.xlu1 %v889_v41, %s4649_s29 }
 0x4e2   : > { %v1270_v42 = vpop.f32.mrb[14].mxu0 }
 0x4e3   : > { %v1272_v43 = vpop.f32.mrb[15].mxu0  ;;  %v1281_v44 = vmul.f32 %v1270_v42, %v4943_v25 }
 0x4e4   : > { %v1282_v45 = vmul.f32 %v1272_v43, %v4923_v14 }
 0x4e6   : > { %v1276_v46 = vpop.f32.mrb[16].mxu0 }
 0x4e7   : > { %v1283_v47 = vmul.f32 %v1276_v46, %v4948_v26  ;;  %v1278_v48 = vpop.f32.mrb[17].mxu0 }
 0x4e8   : > { %v1284_v49 = vmul.f32 %v1278_v48, %v4928_v15 }
 0x4e9   : > { %v1285_v50 = vadd.f32 %v1283_v47, %v1281_v44 }
 0x4ea   : > { %v1292_v51 = vadd.f32 %v1284_v49, %v1282_v45 }
 0x4eb   : > { %v1286_v52 = vrot.slane %v1285_v50, 4 }
 0x4ec   : > { %v1293_v53 = vrot.slane %v1292_v51, 4 }
 0x4ed   : > { %v1287_v54 = vadd.f32 %v1286_v52, %v1285_v50 }
 0x4ee   : > { %v1294_v55 = vadd.f32 %v1293_v53, %v1292_v51 }
 0x4ef   : > { %v1288_v56 = vrot.slane %v1287_v54, 2 }
 0x4f0   : > { %v1295_v57 = vrot.slane %v1294_v55, 2 }
 0x4f1   : > { %v1289_v5 = vadd.f32 %v1288_v56, %v1287_v54 }
 0x4f2   : > { %v1296_v0 = vadd.f32 %v1295_v57, %v1294_v55 }
 0x4f3   : > { %v1290_v9 = vrot.slane %v1289_v5, 1 }
 0x4f4   : > { %v1297_v11 = vrot.slane %v1296_v0, 1 }
 0x4f5   : > { %v1291_v17 = vadd.f32 %v1290_v9, %v1289_v5  ;;  %v5051_v5 = vld [vmem:[%s5388_s2 + $0x30] sm:$0xff] }
 0x4f6   : > { %v1298_v20 = vadd.f32 %v1297_v11, %v1296_v0 }
 0x502   : > { %v1104_v60 = vpop.f32.mrb[8].mxu1 }
 0x503   : > { %v1299_v61 = vmul.f32 %v1104_v60, %v5014_v58  ;;  %v1106_v62 = vpop.f32.mrb[9].mxu1 }
 0x504   : > { %v1300_v3 = vmul.f32 %v1106_v62, %v5019_v59 }
 0x505   : > { %v1303_v1 = vmul.f32 1.442695, %v1299_v61  ;;  %v5044_v61 = vld [vmem:[%s5388_s2 + $0x80] sm:$0xff] }
 0x506   : > { %v1305_v4 = vmul.f32 1.442695, %v1300_v3  ;;  %v1110_v6 = vpop.f32.mrb[10].mxu1 }
 0x507   : > { %4588 = vpow2.f32 %v1303_v1  ;;  %v1301_v7 = vmul.f32 %v1110_v6, %v5026_v63  ;;  %v1112_v8 = vpop.f32.mrb[11].mxu1 }
 0x508   : > { %4590 = vpow2.f32 %v1305_v4  ;;  %v1302_v10 = vmul.f32 %v1112_v8, %v5031_v2 }
 0x509   : > { %v1307_v12 = vmul.f32 1.442695, %v1301_v7 }
 0x50a   : > { %v1309_v13 = vmul.f32 1.442695, %v1302_v10  ;;  %v1187_v16 = vpop.f32.mrb[12].mxu1 }
 0x50b   : > { %4592 = vpow2.f32 %v1307_v12  ;;  %v1315_v18 = vmul.f32 %v1187_v16, %v1104_v60  ;;  %v1189_v19 = vpop.f32.mrb[13].mxu1  ;;  %v1753_v16 = vpop.permute.xlu0 %1752 }
 0x50c   : > { %4594 = vpow2.f32 %v1309_v13  ;;  %v1316_v23 = vmul.f32 %v1189_v19, %v1106_v62  ;;  %v1751_v13 = vpop.permute.xlu1 %1750  ;;  %v5086_v19 = vld [vmem:[%s5388_s2 + $0x88] sm:$0xff] }
 0x50d   : > { %v1319_v27 = vmul.f32 %v1315_v18, %v1291_v17 }
 0x50e   : > { %v1320_v28 = vmul.f32 %v1316_v23, %v1298_v20  ;;  %v1193_v38 = vpop.f32.mrb[14].mxu1  ;;  %v5091_v23 = vld [vmem:[%s5388_s2 + $0x38] sm:$0xff] }
 0x50f   : > { %v1317_v39 = vmul.f32 %v1193_v38, %v1110_v6  ;;  %v1195_v40 = vpop.f32.mrb[15].mxu1 }
 0x510   : > { %v1318_v41 = vmul.f32 %v1195_v40, %v1112_v8 }
 0x511   : > { %v4589_v42 = vpop.eup %4588  ;;  %v1321_v43 = vmul.f32 %v1317_v39, %v1291_v17 }
 0x512   : > { %v4591_v44 = vpop.eup %4590  ;;  %v1322_v45 = vmul.f32 %v1318_v41, %v1298_v20  ;;  %v1311_v46 = vmul.f32 0.0, %v4589_v42  ;;  %v1399_v47 = vpop.f32.mrb[16].mxu1 }
 0x513   : > { %v1312_v48 = vmul.f32 0.0, %v4591_v44  ;;  %v1401_v49 = vpop.f32.mrb[17].mxu1 }
 0x514   : > { %v5035_v50 = vadd.f32 %v1319_v27, %v1311_v46 }
 0x515   : > { %v4593_v51 = vpop.eup %4592  ;;  %v5037_v52 = vadd.f32 %v1320_v28, %v1312_v48 }
 0x516   : > { %v4595_v53 = vpop.eup %4594  ;;  %v1313_v54 = vmul.f32 0.0, %v4593_v51  ;;  %v1405_v55 = vpop.f32.mrb[18].mxu1  ;;  %v1410_v3 = vmul.f32 %v1399_v47, %v5035_v50 }
 0x517   : > { %v1314_v56 = vmul.f32 0.0, %v4595_v53  ;;  %v1407_v57 = vpop.f32.mrb[19].mxu1  ;;  %v1411_v4 = vmul.f32 %v1401_v49, %v5037_v52 }
 0x518   : > { %v5039_v60 = vadd.f32 %v1321_v43, %v1313_v54 }
 0x519   : > { %v5046_v62 = vadd.f32 %v1322_v45, %v1314_v56 }
 0x51a   : > { %v1412_v0 = vmul.f32 %v1405_v55, %v5039_v60  ;;  %v4275_v1 = vpop.f32.mrb[20].mxu1 }
 0x51b   : > { %v1413_v6 = vmul.f32 %v1407_v57, %v5046_v62  ;;  %v1646_v7 = vmul.f32 %v4275_v1, %v5044_v61  ;;  %v1561_v8 = vpop.f32.mrb[21].mxu1  ;;  %v1648_v28 = vmul.f32 %v4275_v1, %v5086_v19 }
 0x51c   : > { %v4399_v9 = vpack.c.bf16 %v1412_v0, %v1410_v3  ;;  %v1645_v10 = vmul.f32 %v1561_v8, %v5051_v5  ;;  %v1647_v39 = vmul.f32 %v1561_v8, %v5091_v23 }
 0x51d   : > { %v4397_v11 = vpack.c.bf16 %v1413_v6, %v1411_v4 }
 0x51e   : > { %v4409_v12 = vpack.c.bf16 %v1646_v7, %v1645_v10 }
 0x51f   : > { %4398 = vmatprep.subr.bf16.mxu0 %v4397_v11 }
 0x520   : > { %4400 = vmatpush1.bf16.xpose.msra.mxu0 %v4399_v9  ;;  %4410 = vmatprep.subr.bf16.mxu1 %v4409_v12 }
 0x521   : > { %4412 = vmatpush3.bf16.msra.mxu1 %v4409_v12  ;;  %4406 = vmatprep.subr.bf16.mxu0 %v4966_v37 }
 0x522   : > { %4418 = vmatprep.subr.bf16.mxu1 %v4872_v31 }
 0x527   : > { %1479 = vmatmul.mubr.f32.vlgmr.msra.gmra.mrb[18].mxu0 %v4877_v32 }
 0x528   : > { %1483 = vmatprep.mubr.f32.mxu0 %v4868_v30  ;;  %4408 = vmatpush3.bf16.msra.mxu0 %v4966_v37 }
 0x529   : > { %4414 = vmatprep.subr.bf16.mxu0 %v4872_v31 }
 0x52b   : > { %1484 = vmatmul.mubr.f32.gmra.mrb[20].mxu0 %v4882_v33 }
 0x52c   : > { %4280 = vmatprep.mubr.msk.f32.mxu0 %vm280_vm0, %v4836_v22  ;;  %v1921_v22 = vpop.permute.xlu1 %1920 }
 0x52f   : > { %4281 = vmatmul.mubr.msk.f32.vlgmr.msra.gmra.mrb[22].mxu0 %vm280_vm0, %v4834_v21  ;;  %v1923_v21 = vpop.permute.xlu0 %1922 }
 0x530   : > { %4416 = vmatpush1.bf16.msra.mxu0 %v4886_v34  ;;  %1822 = vmatprep.mubr.f32.mxu0 %v4646_v35  ;;  %v1836_v38 = vpop.permute.xlu1 %1835 }
 0x531   : > { %4422 = vmatprep.subr.bf16.mxu0 %v4872_v31 }
 0x533   : > { %4066 = vmatmul.mubr.msk.f32.vlgmr.msra.gmra.mrb[24].mxu0 %vm280_vm0, %v1751_v13  ;;  %v1838_v44 = vpop.permute.xlu0 %1837 }
 0x534   : > { %1828 = vmatprep.mubr.f32.mxu0 %v4646_v35  ;;  %4424 = vmatpush1.bf16.msra.mxu0 %v4886_v34  ;;  %v2052_v48 = vpop.permute.xlu1 %2051 }
 0x537   : > { %4067 = vmatmul.mubr.msk.f32.gmra.mrb[26].mxu0 %vm280_vm0, %v1753_v16  ;;  %v2054_v53 = vpop.permute.xlu0 %2053 }
 0x538   : > { %1992 = vmatprep.mubr.f32.mxu0 %v4646_v35  ;;  %v2216_v55 = vpop.permute.xlu1 %2215 }
 0x53b   : > { %4070 = vmatmul.mubr.msk.f32.vlgmr.msra.gmra.mrb[28].mxu0 %vm280_vm0, %v1921_v22  ;;  %v2218_v57 = vpop.permute.xlu0 %2217 }
 0x53c   : > { %1998 = vmatprep.mubr.f32.mxu0 %v4646_v35  ;;  %v2481_v10 = vpop.permute.xlu1 %2480 }
 0x53f   : > { %4071 = vmatmul.mubr.msk.f32.gmra.mrb[30].mxu0 %vm280_vm0, %v1923_v21  ;;  %v2483_v11 = vpop.permute.xlu0 %2482 }
 0x540   : > { %2204 = vmatprep.mubr.f32.mxu0 %v4863_v29  ;;  %v2651_v12 = vpop.permute.xlu1 %2650 }
 0x543   : > { %v2653_v13 = vpop.permute.xlu0 %2652 }
 0x5fa   : > { %v1480_v17 = vpop.f32.mrb[18].mxu0 }
 0x5fb   : > { %v1482_v18 = vpop.f32.mrb[19].mxu0  ;;  %4287 = vmatprep.mubr.msk.f32.mxu1 %vm280_vm0, %v1480_v17 }
 0x5fe   : > { %v1485_v20 = vpop.f32.mrb[20].mxu0 }
 0x5ff   : > { %4288 = vmatmul.mubr.msk.f32.vlgmr.msra.gmra.mrb[22].mxu1 %vm280_vm0, %v1485_v20  ;;  %v1487_v27 = vpop.f32.mrb[21].mxu0 }
 0x600   : > { %4420 = vmatpush1.bf16.msra.mxu1 %v4886_v34  ;;  %1907 = vmatprep.mubr.f32.mxu1 %v4646_v35 }
 0x601   : > { %4426 = vmatprep.subr.bf16.mxu1 %v4932_v24 }
 0x602   : > { %v4282_v40 = vpop.f32.mrb[22].mxu0 }
 0x603   : > { %v1650_v41 = vmul.f32 %v4282_v40, %v1648_v28  ;;  %v1636_v42 = vpop.f32.mrb[23].mxu0  ;;  %4068 = vmatmul.mubr.msk.f32.vlgmr.msra.gmra.mrb[24].mxu1 %vm280_vm0, %v1836_v38 }
 0x604   : > { %v1649_v43 = vmul.f32 %v1647_v39, %v1636_v42  ;;  %1913 = vmatprep.mubr.f32.mxu1 %v4646_v35  ;;  %4428 = vmatpush1.bf16.msra.mxu1 %v4964_v36 }
 0x605   : > { %4434 = vmatprep.subr.bf16.mxu1 %v4966_v37 }
 0x606   : > { %v1651_v45 = vadd.f32 %v1650_v41, %v1649_v43  ;;  %v5103_v46 = vpop.f32.mrb[24].mxu0 }
 0x607   : > { %v5105_v47 = vpop.f32.mrb[25].mxu0  ;;  %4069 = vmatmul.mubr.msk.f32.gmra.mrb[26].mxu1 %vm280_vm0, %v1838_v44  ;;  %v2023_v17 = vmul.f32 %v5103_v46, %v5014_v58 }
 0x608   : > { %2123 = vmatprep.mubr.f32.mxu1 %v4646_v35  ;;  %v1652_v16 = vrot.slane %v1651_v45, 4  ;;  %v2024_v20 = vmul.f32 %v5105_v47, %v5019_v59 }
 0x60a   : > { %v5109_v49 = vpop.f32.mrb[26].mxu0  ;;  %v1653_v22 = vadd.f32 %v1652_v16, %v1651_v45  ;;  %v2029_v41 = vmul.f32 1.442695, %v2024_v20 }
 0x60b   : > { %v5111_v51 = vpop.f32.mrb[27].mxu0  ;;  %4072 = vmatmul.mubr.msk.f32.vlgmr.msra.gmra.mrb[28].mxu1 %vm280_vm0, %v2052_v48  ;;  %v2025_v39 = vmul.f32 %v5109_v49, %v5026_v63 }
 0x60c   : > { %2129 = vmatprep.mubr.f32.mxu1 %v4646_v35  ;;  %4436 = vmatpush3.bf16.msra.mxu1 %v4966_v37  ;;  %v1654_v27 = vrot.slane %v1653_v22, 2  ;;  %v2026_v42 = vmul.f32 %v5111_v51, %v5031_v2 }
 0x60d   : > { %4438 = vmatprep.subr.bf16.mxu1 %v4966_v37  ;;  %v2031_v45 = vmul.f32 1.442695, %v2025_v39 }
 0x60e   : > { %v1994_v54 = vpop.f32.mrb[28].mxu0  ;;  %v1655_v43 = vadd.f32 %v1654_v27, %v1653_v22 }
 0x60f   : > { %v1996_v56 = vpop.f32.mrb[29].mxu0  ;;  %4073 = vmatmul.mubr.msk.f32.gmra.mrb[30].mxu1 %vm280_vm0, %v2054_v53  ;;  %v2005_v0 = vmul.f32 %v1994_v54, %v4943_v25  ;;  %v2033_v53 = vmul.f32 1.442695, %v2026_v42 }
 0x610   : > { %4294 = vmatprep.mubr.msk.f32.mxu1 %vm280_vm0, %v2216_v55  ;;  %v2006_v6 = vmul.f32 %v1996_v56, %v4923_v14  ;;  %v1656_v54 = vrot.slane %v1655_v43, 1 }
 0x612   : > { %v2000_v3 = vpop.f32.mrb[30].mxu0 }
 0x613   : > { %v2007_v1 = vmul.f32 %v2000_v3, %v4948_v26  ;;  %v2002_v4 = vpop.f32.mrb[31].mxu0  ;;  %4295 = vmatmul.mubr.msk.f32.vlgmr.msra.gmra.mrb[32].mxu1 %vm280_vm0, %v2218_v57  ;;  %v1657_v57 = vadd.f32 %v1656_v54, %v1655_v43 }
 0x614   : > { %v2008_v7 = vmul.f32 %v2002_v4, %v4928_v15  ;;  %4440 = vmatpush3.bf16.msra.mxu1 %v4966_v37  ;;  %4301 = vmatprep.mubr.msk.f32.mxu1 %vm280_vm0, %v1836_v38  ;;  %v2027_v38 = vmul.f32 1.442695, %v2023_v17 }
 0x615   : > { %v2009_v8 = vadd.f32 %v2007_v1, %v2005_v0  ;;  %4446 = vmatprep.subr.bf16.mxu1 %v4872_v31  ;;  %v4065_v0 = vld [vmem:[%s5152_s26] ss:$0 sm:$0xff] }
 0x616   : > { %v2016_v9 = vadd.f32 %v2008_v7, %v2006_v6  ;;  %4596 = vpow2.f32 %v2027_v38 }
 0x617   : > { %4302 = vmatmul.mubr.msk.f32.vlgmr.msra.gmra.mrb[34].mxu1 %vm280_vm0, %v1838_v44  ;;  %v2010_v21 = vrot.slane %v2009_v8, 4  ;;  %4598 = vpow2.f32 %v2029_v41 }
 0x618   : > { %4448 = vmatpush1.bf16.msra.mxu1 %v4886_v34  ;;  %2552 = vmatprep.mubr.f32.mxu1 %v4646_v35  ;;  %v2017_v18 = vrot.slane %v2016_v9, 4  ;;  %4600 = vpow2.f32 %v2031_v45 }
 0x619   : > { %4454 = vmatprep.subr.bf16.mxu1 %v4872_v31  ;;  %v2011_v28 = vadd.f32 %v2010_v21, %v2009_v8  ;;  %4602 = vpow2.f32 %v2033_v53 }
 0x61a   : > { %v2018_v40 = vadd.f32 %v2017_v18, %v2016_v9 }
 0x61b   : > { %4084 = vmatmul.mubr.msk.f32.vlgmr.msra.gmra.mrb[36].mxu1 %vm280_vm0, %v2481_v10  ;;  %v2012_v44 = vrot.slane %v2011_v28, 2 }
 0x61c   : > { %2558 = vmatprep.mubr.f32.mxu1 %v4646_v35  ;;  %4456 = vmatpush1.bf16.msra.mxu1 %v4886_v34  ;;  %v2019_v48 = vrot.slane %v2018_v40, 2 }
 0x61d   : > { %v2013_v55 = vadd.f32 %v2012_v44, %v2011_v28 }
 0x61e   : > { %v2020_v56 = vadd.f32 %v2019_v48, %v2018_v40 }
 0x61f   : > { %4085 = vmatmul.mubr.msk.f32.gmra.mrb[38].mxu1 %vm280_vm0, %v2483_v11  ;;  %v2014_v6 = vrot.slane %v2013_v55, 1 }
 0x620   : > { %2722 = vmatprep.mubr.f32.mxu1 %v4646_v35  ;;  %v2021_v8 = vrot.slane %v2020_v56, 1  ;;  %v4597_v10 = vpop.eup %4596 }
 0x621   : > { %v2015_v16 = vadd.f32 %v2014_v6, %v2013_v55  ;;  %v2035_v27 = vmul.f32 %v4597_v10, %v5035_v50 }
 0x622   : > { %v2022_v17 = vadd.f32 %v2021_v8, %v2020_v56 }
 0x623   : > { %4088 = vmatmul.mubr.msk.f32.vlgmr.msra.gmra.mrb[40].mxu1 %vm280_vm0, %v2651_v12 }
 0x624   : > { %2728 = vmatprep.mubr.f32.mxu1 %v4646_v35 }
 0x627   : > { %4089 = vmatmul.mubr.msk.f32.gmra.mrb[42].mxu1 %vm280_vm0, %v2653_v13  ;;  %v4599_v13 = vpop.eup %4598 }
 0x628   : > { %2934 = vmatprep.mubr.f32.mxu1 %v4863_v29  ;;  %v4601_v28 = vpop.eup %4600  ;;  %v2036_v40 = vmul.f32 %v4599_v13, %v5037_v52 }
 0x629   : > { %v4603_v41 = vpop.eup %4602 }
 0x62a   : > { %v2038_v54 = vmul.f32 %v4603_v41, %v5046_v62 }
 0x6d2   : > { %v4289_v3 = vpop.f32.mrb[22].mxu1 }
 0x6d3   : > { %v1736_v1 = vadd.f32 %v4289_v3, %v1657_v57  ;;  %v1730_v4 = vpop.f32.mrb[23].mxu1 }
 0x6d4   : > { %v1731_v7 = vadd.f32 %v1730_v4, %v1657_v57 }
 0x6d5   : > { %v1747_v9 = vadd.f32 %v4065_v0, %v1736_v1 }
 0x6d6   : > { %v1746_v11 = vadd.f32 %v4065_v0, %v1731_v7  ;;  %v1909_v12 = vpop.f32.mrb[24].mxu1 }
 0x6d7   : > { %1749 = vst [vmem:[%s5159_s30 + $0x8] sm:$0xff] %v1747_v9  ;;  %v2039_v22 = vmul.f32 %v1909_v12, %v5103_v46  ;;  %v1911_v21 = vpop.f32.mrb[25].mxu1 }
 0x6d8   : > { %1748 = vst [vmem:[%s5159_s30] sm:$0xff] %v1746_v11  ;;  %v2040_v18 = vmul.f32 %v1911_v21, %v5105_v47  ;;  %v2037_v47 = vmul.f32 %v4601_v28, %v5039_v60 }
 0x6d9   : > { %v2043_v20 = vmul.f32 %v2039_v22, %v2015_v16 }
 0x6da   : > { %v2044_v38 = vmul.f32 %v2040_v18, %v2022_v17  ;;  %v1915_v39 = vpop.f32.mrb[26].mxu1 }
 0x6db   : > { %v2041_v42 = vmul.f32 %v1915_v39, %v5109_v49  ;;  %v1917_v43 = vpop.f32.mrb[27].mxu1  ;;  %v5168_v44 = vadd.f32 %v2043_v20, %v2035_v27 }
 0x6dc   : > { %v2042_v46 = vmul.f32 %v1917_v43, %v5111_v51  ;;  %v5171_v45 = vadd.f32 %v2044_v38, %v2036_v40 }
 0x6dd   : > { %v2045_v48 = vmul.f32 %v2041_v42, %v2015_v16 }
 0x6de   : > { %v2046_v53 = vmul.f32 %v2042_v46, %v2022_v17  ;;  %v2125_v50 = vpop.f32.mrb[28].mxu1 }
 0x6df   : > { %v2136_v55 = vmul.f32 %v2125_v50, %v5168_v44  ;;  %v2127_v52 = vpop.f32.mrb[29].mxu1  ;;  %v2049_v56 = vadd.f32 %v2045_v48, %v2037_v47 }
 0x6e0   : > { %v2137_v49 = vmul.f32 %v2127_v52, %v5171_v45  ;;  %v2050_v57 = vadd.f32 %v2046_v53, %v2038_v54 }
 0x6e2   : > { %v2131_v3 = vpop.f32.mrb[30].mxu1 }
 0x6e3   : > { %v2138_v0 = vmul.f32 %v2131_v3, %v2049_v56  ;;  %v2133_v1 = vpop.f32.mrb[31].mxu1 }
 0x6e4   : > { %v2139_v51 = vmul.f32 %v2133_v1, %v2050_v57 }
 0x6e5   : > { %v4431_v4 = vpack.c.bf16 %v2138_v0, %v2136_v55 }
 0x6e6   : > { %v4429_v6 = vpack.c.bf16 %v2139_v51, %v2137_v49  ;;  %v4296_v7 = vpop.f32.mrb[32].mxu1 }
 0x6e7   : > { %v2374_v60 = vmul.f32 %v4296_v7, %v5044_v61  ;;  %v2289_v8 = vpop.f32.mrb[33].mxu1  ;;  %v2376_v62 = vmul.f32 %v4296_v7, %v5086_v19 }
 0x6e8   : > { %v2373_v9 = vmul.f32 %v2289_v8, %v5051_v5  ;;  %4430 = vmatprep.subr.bf16.mxu0 %v4429_v6  ;;  %v2375_v10 = vmul.f32 %v2289_v8, %v5091_v23 }
 0x6e9   : > { %4432 = vmatpush1.bf16.xpose.msra.mxu0 %v4431_v4 }
 0x6ea   : > { %v4441_v11 = vpack.c.bf16 %v2374_v60, %v2373_v9  ;;  %v4303_v12 = vpop.f32.mrb[34].mxu1 }
 0x6eb   : > { %v2378_v13 = vmul.f32 %v4303_v12, %v2376_v62  ;;  %v2364_v16 = vpop.f32.mrb[35].mxu1 }
 0x6ec   : > { %v2377_v22 = vmul.f32 %v2375_v10, %v2364_v16  ;;  %4442 = vmatprep.subr.bf16.mxu0 %v4441_v11 }
 0x6ee   : > { %v5181_v21 = vadd.f32 %v2378_v13, %v2377_v22  ;;  %v5183_v17 = vpop.f32.mrb[36].mxu1 }
 0x6ef   : > { %v2753_v18 = vmul.f32 %v5183_v17, %v5014_v58  ;;  %v5187_v20 = vpop.f32.mrb[37].mxu1 }
 0x6f0   : > { %v2754_v27 = vmul.f32 %v5187_v20, %v5019_v59  ;;  %2205 = vmatmul.mubr.f32.vlgmr.msra.gmra.mrb[32].mxu0 %v4877_v32  ;;  %v2380_v16 = vrot.slane %v5181_v21, 4 }
 0x6f1   : > { %v2757_v28 = vmul.f32 1.442695, %v2753_v18  ;;  %4444 = vmatpush3.bf16.msra.mxu0 %v4441_v11  ;;  %2209 = vmatprep.mubr.f32.mxu0 %v4868_v30 }
 0x6f2   : > { %v2759_v38 = vmul.f32 1.442695, %v2754_v27  ;;  %v5193_v39 = vpop.f32.mrb[38].mxu1  ;;  %4450 = vmatprep.subr.bf16.mxu0 %v4872_v31  ;;  %v2381_v22 = vadd.f32 %v2380_v16, %v5181_v21 }
 0x6f3   : > { %4604 = vpow2.f32 %v2757_v28  ;;  %v2755_v40 = vmul.f32 %v5193_v39, %v5026_v63  ;;  %v5198_v41 = vpop.f32.mrb[39].mxu1 }
 0x6f4   : > { %4606 = vpow2.f32 %v2759_v38  ;;  %v2756_v42 = vmul.f32 %v5198_v41, %v5031_v2  ;;  %2210 = vmatmul.mubr.f32.gmra.mrb[34].mxu0 %v4882_v33  ;;  %v2382_v28 = vrot.slane %v2381_v22, 2 }
 0x6f5   : > { %v2761_v32 = vmul.f32 1.442695, %v2755_v40 }
 0x6f6   : > { %v2763_v43 = vmul.f32 1.442695, %v2756_v42  ;;  %v2724_v30 = vpop.f32.mrb[40].mxu1  ;;  %v2383_v42 = vadd.f32 %v2382_v28, %v2381_v22 }
 0x6f7   : > { %4608 = vpow2.f32 %v2761_v32  ;;  %v2726_v46 = vpop.f32.mrb[41].mxu1  ;;  %v2735_v47 = vmul.f32 %v2724_v30, %v4943_v25 }
 0x6f8   : > { %4610 = vpow2.f32 %v2763_v43  ;;  %v2736_v54 = vmul.f32 %v2726_v46, %v4923_v14  ;;  %v2384_v30 = vrot.slane %v2383_v42, 1 }
 0x6fa   : > { %v2730_v48 = vpop.f32.mrb[42].mxu1 }
 0x6fb   : > { %v2737_v53 = vmul.f32 %v2730_v48, %v4948_v26  ;;  %v2732_v50 = vpop.f32.mrb[43].mxu1 }
 0x6fc   : > { %v2738_v55 = vmul.f32 %v2732_v50, %v4928_v15 }
 0x6fd   : > { %v4605_v52 = vpop.eup %4604  ;;  %v2739_v49 = vadd.f32 %v2737_v53, %v2735_v47  ;;  %v2385_v47 = vadd.f32 %v2384_v30, %v2383_v42  ;;  %v4081_v53 = vld [vmem:[%s5152_s26 + $0x1] ss:$0 sm:$0xff] }
 0x6fe   : > { %v4607_v3 = vpop.eup %4606  ;;  %v2746_v33 = vadd.f32 %v2738_v55, %v2736_v54  ;;  %v5208_v0 = vmul.f32 %v4605_v52, %v5168_v44  ;;  %v2566_v44 = vpop.permute.xlu1 %2565 }
 0x6ff   : > { %v5211_v1 = vmul.f32 %v4607_v3, %v5171_v45  ;;  %v2568_v45 = vpop.permute.xlu0 %2567  ;;  %v2740_v18 = vrot.slane %v2739_v49, 4 }
 0x700   : > { %v2747_v27 = vrot.slane %v2746_v33, 4 }
 0x701   : > { %v4609_v51 = vpop.eup %4608  ;;  %v2741_v38 = vadd.f32 %v2740_v18, %v2739_v49 }
 0x702   : > { %v4611_v4 = vpop.eup %4610  ;;  %v5213_v6 = vmul.f32 %v4609_v51, %v2049_v56  ;;  %v2782_v56 = vpop.permute.xlu1 %2781  ;;  %v2748_v40 = vadd.f32 %v2747_v27, %v2746_v33 }
 0x703   : > { %v5215_v7 = vmul.f32 %v4611_v4, %v2050_v57  ;;  %v2784_v57 = vpop.permute.xlu0 %2783  ;;  %v2742_v32 = vrot.slane %v2741_v38, 2 }
 0x704   : > { %v2749_v43 = vrot.slane %v2748_v40, 2 }
 0x705   : > { %v2743_v46 = vadd.f32 %v2742_v32, %v2741_v38 }
 0x706   : > { %v2946_v9 = vpop.permute.xlu1 %2945  ;;  %v2750_v48 = vadd.f32 %v2749_v43, %v2748_v40 }
 0x707   : > { %v2948_v62 = vpop.permute.xlu0 %2947  ;;  %v2744_v55 = vrot.slane %v2743_v46, 1 }
 0x708   : > { %v2751_v52 = vrot.slane %v2750_v48, 1 }
 0x709   : > { %v2745_v33 = vadd.f32 %v2744_v55, %v2743_v46 }
 0x70a   : > { %v3211_v10 = vpop.permute.xlu1 %3210 }
 0x70b   : > { %v3213_v11 = vpop.permute.xlu0 %3212 }
 0x70e   : > { %v3381_v12 = vpop.permute.xlu1 %3380 }
 0x70f   : > { %v3383_v13 = vpop.permute.xlu0 %3382 }
 0x7c3   : > { %v2206_v60 = vpop.f32.mrb[32].mxu0 }
 0x7c4   : > { %v2208_v14 = vpop.f32.mrb[33].mxu0  ;;  %4308 = vmatprep.mubr.msk.f32.mxu0 %vm280_vm0, %v2206_v60 }
 0x7c5   : > { %v2752_v14 = vadd.f32 %v2751_v52, %v2750_v48 }
 0x7c7   : > { %v2211_v15 = vpop.f32.mrb[34].mxu0 }
 0x7c8   : > { %4309 = vmatmul.mubr.msk.f32.vlgmr.msra.gmra.mrb[36].mxu0 %vm280_vm0, %v2211_v15  ;;  %v2213_v8 = vpop.f32.mrb[35].mxu0 }
 0x7c9   : > { %4452 = vmatpush1.bf16.msra.mxu0 %v4886_v34  ;;  %2637 = vmatprep.mubr.f32.mxu0 %v4646_v35 }
 0x7ca   : > { %4458 = vmatprep.subr.bf16.mxu0 %v4932_v24 }
 0x7cc   : > { %4086 = vmatmul.mubr.msk.f32.vlgmr.msra.gmra.mrb[38].mxu0 %vm280_vm0, %v2566_v44 }
 0x7cd   : > { %2643 = vmatprep.mubr.f32.mxu0 %v4646_v35  ;;  %4460 = vmatpush1.bf16.msra.mxu0 %v4964_v36 }
 0x7ce   : > { %4466 = vmatprep.subr.bf16.mxu0 %v4966_v37 }
 0x7d0   : > { %4087 = vmatmul.mubr.msk.f32.gmra.mrb[40].mxu0 %vm280_vm0, %v2568_v45 }
 0x7d1   : > { %2853 = vmatprep.mubr.f32.mxu0 %v4646_v35 }
 0x7d4   : > { %4090 = vmatmul.mubr.msk.f32.vlgmr.msra.gmra.mrb[42].mxu0 %vm280_vm0, %v2782_v56 }
 0x7d5   : > { %2859 = vmatprep.mubr.f32.mxu0 %v4646_v35  ;;  %4468 = vmatpush3.bf16.msra.mxu0 %v4966_v37 }
 0x7d6   : > { %4470 = vmatprep.subr.bf16.mxu0 %v4966_v37 }
 0x7d8   : > { %4091 = vmatmul.mubr.msk.f32.gmra.mrb[44].mxu0 %vm280_vm0, %v2784_v57 }
 0x7d9   : > { %4315 = vmatprep.mubr.msk.f32.mxu0 %vm280_vm0, %v2946_v9 }
 0x7dc   : > { %4316 = vmatmul.mubr.msk.f32.vlgmr.msra.gmra.mrb[46].mxu0 %vm280_vm0, %v2948_v62 }
 0x7dd   : > { %4472 = vmatpush3.bf16.msra.mxu0 %v4966_v37  ;;  %4322 = vmatprep.mubr.msk.f32.mxu0 %vm280_vm0, %v2566_v44 }
 0x7de   : > { %4478 = vmatprep.subr.bf16.mxu0 %v4872_v31 }
 0x7e0   : > { %4323 = vmatmul.mubr.msk.f32.vlgmr.msra.gmra.mrb[48].mxu0 %vm280_vm0, %v2568_v45 }
 0x7e1   : > { %4480 = vmatpush1.bf16.msra.mxu0 %v4886_v34  ;;  %3282 = vmatprep.mubr.f32.mxu0 %v4646_v35 }
 0x7e2   : > { %4486 = vmatprep.subr.bf16.mxu0 %v4872_v31 }
 0x7e4   : > { %4102 = vmatmul.mubr.msk.f32.vlgmr.msra.gmra.mrb[50].mxu0 %vm280_vm0, %v3211_v10 }
 0x7e5   : > { %3288 = vmatprep.mubr.f32.mxu0 %v4646_v35  ;;  %4488 = vmatpush1.bf16.msra.mxu0 %v4886_v34 }
 0x7e8   : > { %4103 = vmatmul.mubr.msk.f32.gmra.mrb[52].mxu0 %vm280_vm0, %v3213_v11 }
 0x7e9   : > { %3452 = vmatprep.mubr.f32.mxu0 %v4646_v35 }
 0x7ec   : > { %4106 = vmatmul.mubr.msk.f32.vlgmr.msra.gmra.mrb[54].mxu0 %vm280_vm0, %v3381_v12 }
 0x7ed   : > { %3458 = vmatprep.mubr.f32.mxu0 %v4646_v35 }
 0x7f0   : > { %4107 = vmatmul.mubr.msk.f32.gmra.mrb[56].mxu0 %vm280_vm0, %v3383_v13 }
 0x7f1   : > { %3664 = vmatprep.mubr.f32.mxu0 %v4863_v29 }
 0x89b   : > { %v4310_v29 = vpop.f32.mrb[36].mxu0 }
 0x89c   : > { %v2464_v50 = vadd.f32 %v4310_v29, %v2385_v47  ;;  %v2458_v54 = vpop.f32.mrb[37].mxu0 }
 0x89d   : > { %v2459_v21 = vadd.f32 %v2458_v54, %v2385_v47 }
 0x89e   : > { %v2476_v3 = vadd.f32 %v4081_v53, %v2464_v50 }
 0x89f   : > { %v2475_v51 = vadd.f32 %v4081_v53, %v2459_v21  ;;  %v2639_v49 = vpop.f32.mrb[38].mxu0  ;;  %v5293_v21 = vld [vmem:[%s5388_s2 + $0x10] sm:$0xff] }
 0x8a0   : > { %4083 = vst [vmem:[%s5159_s30 + $0x18] sm:$0xff] %v2476_v3  ;;  %v2769_v4 = vmul.f32 %v2639_v49, %v5183_v17  ;;  %v2641_v60 = vpop.f32.mrb[39].mxu0  ;;  %v5299_v3 = vld [vmem:[%s5388_s2 + $0x68] sm:$0xff] }
 0x8a1   : > { %4082 = vst [vmem:[%s5159_s30 + $0x10] sm:$0xff] %v2475_v51  ;;  %v2770_v15 = vmul.f32 %v2641_v60, %v5187_v20 }
 0x8a2   : > { %v2773_v8 = vmul.f32 %v2769_v4, %v2745_v33  ;;  %v5314_v4 = vld [vmem:[%s5388_s2 + $0x60] sm:$0xff] }
 0x8a3   : > { %v2774_v44 = vmul.f32 %v2770_v15, %v2752_v14  ;;  %v2645_v45 = vpop.f32.mrb[40].mxu0 }
 0x8a4   : > { %v2771_v56 = vmul.f32 %v2645_v45, %v5193_v39  ;;  %v2647_v57 = vpop.f32.mrb[41].mxu0  ;;  %v5260_v9 = vadd.f32 %v2773_v8, %v5208_v0 }
 0x8a5   : > { %v2772_v62 = vmul.f32 %v2647_v57, %v5198_v41  ;;  %v5264_v10 = vadd.f32 %v2774_v44, %v5211_v1  ;;  %v4624_v57 = vld [vmem:[%s5388_s2 + $0x78] sm:$0xff] }
 0x8a6   : > { %v2775_v17 = vmul.f32 %v2771_v56, %v2745_v33 }
 0x8a7   : > { %v2776_v11 = vmul.f32 %v2772_v62, %v2752_v14  ;;  %v2855_v12 = vpop.f32.mrb[42].mxu0 }
 0x8a8   : > { %v2866_v13 = vmul.f32 %v2855_v12, %v5260_v9  ;;  %v2857_v20 = vpop.f32.mrb[43].mxu0  ;;  %v5268_v16 = vadd.f32 %v2775_v17, %v5213_v6 }
 0x8a9   : > { %v2867_v39 = vmul.f32 %v2857_v20, %v5264_v10  ;;  %v5272_v22 = vadd.f32 %v2776_v11, %v5215_v7 }
 0x8ab   : > { %v2861_v0 = vpop.f32.mrb[44].mxu0 }
 0x8ac   : > { %v2868_v41 = vmul.f32 %v2861_v0, %v5268_v16  ;;  %v2863_v18 = vpop.f32.mrb[45].mxu0 }
 0x8ad   : > { %v2869_v1 = vmul.f32 %v2863_v18, %v5272_v22 }
 0x8ae   : > { %v4463_v27 = vpack.c.bf16 %v2868_v41, %v2866_v13 }
 0x8af   : > { %v4461_v28 = vpack.c.bf16 %v2869_v1, %v2867_v39  ;;  %v4317_v38 = vpop.f32.mrb[46].mxu0 }
 0x8b0   : > { %v3104_v40 = vmul.f32 %v4317_v38, %v5044_v61  ;;  %v3019_v42 = vpop.f32.mrb[47].mxu0  ;;  %v3106_v32 = vmul.f32 %v4317_v38, %v5086_v19 }
 0x8b1   : > { %v3103_v6 = vmul.f32 %v3019_v42, %v5051_v5  ;;  %4462 = vmatprep.subr.bf16.mxu1 %v4461_v28  ;;  %v3105_v7 = vmul.f32 %v3019_v42, %v5091_v23 }
 0x8b2   : > { %4464 = vmatpush1.bf16.xpose.msra.mxu1 %v4463_v27 }
 0x8b3   : > { %v4473_v43 = vpack.c.bf16 %v3104_v40, %v3103_v6  ;;  %v4324_v30 = vpop.f32.mrb[48].mxu0 }
 0x8b4   : > { %v3108_v46 = vmul.f32 %v4324_v30, %v3106_v32  ;;  %v3094_v48 = vpop.f32.mrb[49].mxu0 }
 0x8b5   : > { %v3107_v47 = vmul.f32 %v3105_v7, %v3094_v48  ;;  %4474 = vmatprep.subr.bf16.mxu1 %v4473_v43 }
 0x8b7   : > { %v5280_v29 = vadd.f32 %v3108_v46, %v3107_v47  ;;  %v5282_v53 = vpop.f32.mrb[50].mxu0 }
 0x8b8   : > { %v3483_v50 = vmul.f32 %v5282_v53, %v5014_v58  ;;  %v5286_v54 = vpop.f32.mrb[51].mxu0 }
 0x8b9   : > { %v3484_v55 = vmul.f32 %v5286_v54, %v5019_v59  ;;  %2935 = vmatmul.mubr.f32.vlgmr.msra.gmra.mrb[44].mxu1 %v5293_v21 }
 0x8ba   : > { %v3487_v52 = vmul.f32 1.442695, %v3483_v50  ;;  %4476 = vmatpush3.bf16.msra.mxu1 %v4473_v43  ;;  %2939 = vmatprep.mubr.f32.mxu1 %v5299_v3 }
 0x8bb   : > { %v3489_v58 = vmul.f32 1.442695, %v3484_v55  ;;  %v5302_v51 = vpop.f32.mrb[52].mxu0  ;;  %4482 = vmatprep.subr.bf16.mxu1 %v4872_v31  ;;  %v4099_v55 = vld [vmem:[%s5152_s26 + $0x2] ss:$0 sm:$0xff] }
 0x8bc   : > { %4612 = vpow2.f32 %v3487_v52  ;;  %v3485_v59 = vmul.f32 %v5302_v51, %v5026_v63  ;;  %v5307_v49 = vpop.f32.mrb[53].mxu0 }
 0x8bd   : > { %4614 = vpow2.f32 %v3489_v58  ;;  %v3486_v33 = vmul.f32 %v5307_v49, %v5031_v2  ;;  %2940 = vmatmul.mubr.f32.gmra.mrb[46].mxu1 %v5314_v4  ;;  %v4623_v2 = vld [vmem:[%s5388_s2 + $0x28] sm:$0xff] }
 0x8be   : > { %v3491_v60 = vmul.f32 1.442695, %v3485_v59 }
 0x8bf   : > { %v3493_v14 = vmul.f32 1.442695, %v3486_v33  ;;  %v3454_v31 = vpop.f32.mrb[54].mxu0 }
 0x8c0   : > { %4616 = vpow2.f32 %v3491_v60  ;;  %v3456_v15 = vpop.f32.mrb[55].mxu0  ;;  %v3465_v8 = vmul.f32 %v3454_v31, %v4943_v25 }
 0x8c1   : > { %4618 = vpow2.f32 %v3493_v14  ;;  %v3466_v56 = vmul.f32 %v4623_v2, %v3456_v15 }
 0x8c3   : > { %v3460_v63 = vpop.f32.mrb[56].mxu0 }
 0x8c4   : > { %v3467_v44 = vmul.f32 %v3460_v63, %v4948_v26  ;;  %v3462_v45 = vpop.f32.mrb[57].mxu0 }
 0x8c5   : > { %v3468_v62 = vmul.f32 %v4624_v57, %v3462_v45 }
 0x8c6   : > { %v4613_v17 = vpop.eup %4612  ;;  %v3469_v11 = vadd.f32 %v3467_v44, %v3465_v8 }
 0x8c7   : > { %v4615_v12 = vpop.eup %4614  ;;  %v3476_v13 = vadd.f32 %v3468_v62, %v3466_v56  ;;  %v5326_v20 = vmul.f32 %v4613_v17, %v5260_v9 }
 0x8c8   : > { %v5329_v25 = vmul.f32 %v4615_v12, %v5264_v10  ;;  %v3296_v10 = vpop.permute.xlu1 %3295  ;;  %v3470_v38 = vrot.slane %v3469_v11, 4 }
 0x8c9   : > { %v3477_v40 = vrot.slane %v3476_v13, 4 }
 0x8ca   : > { %v4617_v26 = vpop.eup %4616  ;;  %v3471_v6 = vadd.f32 %v3470_v38, %v3469_v11 }
 0x8cb   : > { %v4619_v39 = vpop.eup %4618  ;;  %v5332_v0 = vmul.f32 %v4617_v26, %v5268_v16  ;;  %v3298_v16 = vpop.permute.xlu0 %3297  ;;  %v3478_v32 = vadd.f32 %v3477_v40, %v3476_v13 }
 0x8cc   : > { %v5335_v41 = vmul.f32 %v4619_v39, %v5272_v22  ;;  %v3512_v22 = vpop.permute.xlu1 %3511  ;;  %v3472_v43 = vrot.slane %v3471_v6, 2 }
 0x8cd   : > { %v3479_v30 = vrot.slane %v3478_v32, 2 }
 0x8cf   : > { %v3480_v48 = vadd.f32 %v3479_v30, %v3478_v32 }
 0x8d1   : > { %v3481_v33 = vrot.slane %v3480_v48, 1 }
 0x8d3   : > { %v3482_v44 = vadd.f32 %v3481_v33, %v3480_v48 }
 0x98c   : > { %v2936_v18 = vpop.f32.mrb[44].mxu1 }
 0x98d   : > { %v2938_v1 = vpop.f32.mrb[45].mxu1  ;;  %4329 = vmatprep.mubr.msk.f32.mxu1 %vm280_vm0, %v2936_v18 }
 0x990   : > { %v2941_v27 = vpop.f32.mrb[46].mxu1 }
 0x991   : > { %4330 = vmatmul.mubr.msk.f32.vlgmr.msra.gmra.mrb[48].mxu1 %vm280_vm0, %v2941_v27  ;;  %v2943_v9 = vpop.f32.mrb[47].mxu1 }
 0x992   : > { %4484 = vmatpush1.bf16.msra.mxu1 %v4886_v34  ;;  %3367 = vmatprep.mubr.f32.mxu1 %v4646_v35  ;;  %v3514_v34 = vpop.permute.xlu0 %3513 }
 0x993   : > { %4490 = vmatprep.subr.bf16.mxu1 %v4932_v24  ;;  %v3676_v24 = vpop.permute.xlu1 %3675 }
 0x995   : > { %4104 = vmatmul.mubr.msk.f32.vlgmr.msra.gmra.mrb[50].mxu1 %vm280_vm0, %v3296_v10 }
 0x996   : > { %3373 = vmatprep.mubr.f32.mxu1 %v4646_v35  ;;  %4492 = vmatpush1.bf16.msra.mxu1 %v4964_v36  ;;  %v3678_v36 = vpop.permute.xlu0 %3677 }
 0x997   : > { %4498 = vmatprep.subr.bf16.mxu1 %v4966_v37 }
 0x999   : > { %4105 = vmatmul.mubr.msk.f32.gmra.mrb[52].mxu1 %vm280_vm0, %v3298_v16 }
 0x99a   : > { %3583 = vmatprep.mubr.f32.mxu1 %v4646_v35 }
 0x99d   : > { %4108 = vmatmul.mubr.msk.f32.vlgmr.msra.gmra.mrb[54].mxu1 %vm280_vm0, %v3512_v22 }
 0x99e   : > { %3589 = vmatprep.mubr.f32.mxu1 %v4646_v35  ;;  %4500 = vmatpush3.bf16.msra.mxu1 %v4966_v37  ;;  %v3110_v35 = vrot.slane %v5280_v29, 4 }
 0x99f   : > { %4502 = vmatprep.subr.bf16.mxu1 %v4966_v37 }
 0x9a0   : > { %v3111_v28 = vadd.f32 %v3110_v35, %v5280_v29 }
 0x9a1   : > { %4109 = vmatmul.mubr.msk.f32.gmra.mrb[56].mxu1 %vm280_vm0, %v3514_v34 }
 0x9a2   : > { %4336 = vmatprep.mubr.msk.f32.mxu1 %vm280_vm0, %v3676_v24  ;;  %v3112_v42 = vrot.slane %v3111_v28, 2 }
 0x9a4   : > { %v3113_v7 = vadd.f32 %v3112_v42, %v3111_v28 }
 0x9a5   : > { %4337 = vmatmul.mubr.msk.f32.vlgmr.msra.gmra.mrb[58].mxu1 %vm280_vm0, %v3678_v36 }
 0x9a6   : > { %4504 = vmatpush3.bf16.msra.mxu1 %v4966_v37  ;;  %4343 = vmatprep.mubr.msk.f32.mxu1 %vm280_vm0, %v3296_v10  ;;  %v3114_v46 = vrot.slane %v3113_v7, 1  ;;  %v3473_v37 = vadd.f32 %v3472_v43, %v3471_v6 }
 0x9a8   : > { %v3115_v47 = vadd.f32 %v3114_v46, %v3113_v7  ;;  %v3474_v59 = vrot.slane %v3473_v37, 1 }
 0x9a9   : > { %4344 = vmatmul.mubr.msk.f32.vlgmr.msra.gmra.mrb[60].mxu1 %vm280_vm0, %v3298_v16 }
 0x9aa   : > { %v3475_v15 = vadd.f32 %v3474_v59, %v3473_v37 }
 0xa64   : > { %v4331_v50 = vpop.f32.mrb[48].mxu1 }
 0xa65   : > { %v3194_v52 = vadd.f32 %v4331_v50, %v3115_v47  ;;  %v3188_v58 = vpop.f32.mrb[49].mxu1 }
 0xa66   : > { %v3189_v29 = vadd.f32 %v3188_v58, %v3115_v47 }
 0xa67   : > { %v3206_v60 = vadd.f32 %v4099_v55, %v3194_v52 }
 0xa68   : > { %v3205_v14 = vadd.f32 %v4099_v55, %v3189_v29  ;;  %v3369_v31 = vpop.f32.mrb[50].mxu1 }
 0xa69   : > { %4101 = vst [vmem:[%s5159_s30 + $0x28] sm:$0xff] %v3206_v60  ;;  %v3499_v63 = vmul.f32 %v3369_v31, %v5282_v53  ;;  %v3371_v8 = vpop.f32.mrb[51].mxu1 }
 0xa6a   : > { %4100 = vst [vmem:[%s5159_s30 + $0x20] sm:$0xff] %v3205_v14  ;;  %v3500_v45 = vmul.f32 %v3371_v8, %v5286_v54 }
 0xa6b   : > { %v3503_v2 = vmul.f32 %v3499_v63, %v3475_v15 }
 0xa6c   : > { %v3504_v56 = vmul.f32 %v3500_v45, %v3482_v44  ;;  %v3375_v57 = vpop.f32.mrb[52].mxu1 }
 0xa6d   : > { %v3501_v62 = vmul.f32 %v3375_v57, %v5302_v51  ;;  %v3377_v17 = vpop.f32.mrb[53].mxu1  ;;  %v3507_v11 = vadd.f32 %v3503_v2, %v5326_v20 }
 0xa6e   : > { %v3502_v12 = vmul.f32 %v3377_v17, %v5307_v49  ;;  %v3508_v13 = vadd.f32 %v3504_v56, %v5329_v25 }
 0xa6f   : > { %v3505_v26 = vmul.f32 %v3501_v62, %v3475_v15 }
 0xa70   : > { %v3506_v39 = vmul.f32 %v3502_v12, %v3482_v44  ;;  %v3585_v53 = vpop.f32.mrb[54].mxu1 }
 0xa71   : > { %v3596_v18 = vmul.f32 %v3585_v53, %v3507_v11  ;;  %v3587_v1 = vpop.f32.mrb[55].mxu1  ;;  %v3509_v27 = vadd.f32 %v3505_v26, %v5332_v0 }
 0xa72   : > { %v3597_v54 = vmul.f32 %v3587_v1, %v3508_v13  ;;  %v3510_v9 = vadd.f32 %v3506_v39, %v5335_v41 }
 0xa74   : > { %v3591_v10 = vpop.f32.mrb[56].mxu1 }
 0xa75   : > { %v3598_v16 = vmul.f32 %v3591_v10, %v3509_v27  ;;  %v3593_v51 = vpop.f32.mrb[57].mxu1 }
 0xa76   : > { %v3599_v22 = vmul.f32 %v3593_v51, %v3510_v9 }
 0xa77   : > { %v4495_v34 = vpack.c.bf16 %v3598_v16, %v3596_v18 }
 0xa78   : > { %v4493_v20 = vpack.c.bf16 %v3599_v22, %v3597_v54  ;;  %v4338_v24 = vpop.f32.mrb[58].mxu1 }
 0xa79   : > { %v3834_v49 = vmul.f32 %v4338_v24, %v5044_v61  ;;  %v3749_v25 = vpop.f32.mrb[59].mxu1  ;;  %v3836_v35 = vmul.f32 %v4338_v24, %v5086_v19 }
 0xa7a   : > { %v3833_v36 = vmul.f32 %v3749_v25, %v5051_v5  ;;  %4494 = vmatprep.subr.bf16.mxu0 %v4493_v20  ;;  %v3835_v0 = vmul.f32 %v3749_v25, %v5091_v23 }
 0xa7b   : > { %4496 = vmatpush1.bf16.xpose.msra.mxu0 %v4495_v34 }
 0xa7c   : > { %v4505_v28 = vpack.c.bf16 %v3834_v49, %v3833_v36  ;;  %v4345_v41 = vpop.f32.mrb[60].mxu1 }
 0xa7d   : > { %v3838_v38 = vmul.f32 %v4345_v41, %v3836_v35  ;;  %v3824_v40 = vpop.f32.mrb[61].mxu1 }
 0xa7e   : > { %v3837_v42 = vmul.f32 %v3835_v0, %v3824_v40  ;;  %4506 = vmatprep.subr.bf16.mxu0 %v4505_v28 }
 0xa80   : > { %v3839_v6 = vadd.f32 %v3838_v38, %v3837_v42 }
 0xa82   : > { %3665 = vmatmul.mubr.f32.vlgmr.msra.gmra.mrb[58].mxu0 %v5293_v21  ;;  %v3840_v32 = vrot.slane %v3839_v6, 4 }
 0xa83   : > { %4508 = vmatpush3.bf16.msra.mxu0 %v4505_v28  ;;  %3669 = vmatprep.mubr.f32.mxu0 %v5299_v3  ;;  %v4117_v3 = vld [vmem:[%s5152_s26 + $0x3] ss:$0 sm:$0xff] }
 0xa84   : > { %v3841_v7 = vadd.f32 %v3840_v32, %v3839_v6 }
 0xa86   : > { %3670 = vmatmul.mubr.f32.gmra.mrb[60].mxu0 %v5314_v4  ;;  %v3842_v43 = vrot.slane %v3841_v7, 2 }
 0xa88   : > { %v3843_v21 = vadd.f32 %v3842_v43, %v3841_v7 }
 0xa8a   : > { %v3844_v30 = vrot.slane %v3843_v21, 1 }
 0xa8c   : > { %v3845_v46 = vadd.f32 %v3844_v30, %v3843_v21 }
 0xb55   : > { %v3666_v61 = vpop.f32.mrb[58].mxu0 }
 0xb56   : > { %v3668_v5 = vpop.f32.mrb[59].mxu0  ;;  %4350 = vmatprep.mubr.msk.f32.mxu0 %vm280_vm0, %v3666_v61 }
 0xb59   : > { %v3671_v19 = vpop.f32.mrb[60].mxu0 }
 0xb5a   : > { %4351 = vmatmul.mubr.msk.f32.vlgmr.msra.gmra.mrb[62].mxu0 %vm280_vm0, %v3671_v19  ;;  %v3673_v23 = vpop.f32.mrb[61].mxu0 }
 0xc2d   : > { %v4352_v37 = vpop.f32.mrb[62].mxu0 }
 0xc2e   : > { %v3924_v48 = vadd.f32 %v4352_v37, %v3845_v46  ;;  %v3918_v4 = vpop.f32.mrb[63].mxu0 }
 0xc2f   : > { %v3919_v47 = vadd.f32 %v3918_v4, %v3845_v46 }
 0xc30   : > { %v3936_v50 = vadd.f32 %v4117_v3, %v3924_v48 }
 0xc31   : > { %v3935_v55 = vadd.f32 %v4117_v3, %v3919_v47 }
 0xc32   : > { %4119 = vst [vmem:[%s5159_s30 + $0x38] sm:$0xff] %v3936_v50 }
 0xc33   : > { %4118 = vst [vmem:[%s5159_s30 + $0x30] sm:$0xff] %v3935_v55 }
 0xc34 PF: > { %s15_s18 = sadd.s32 1, %s4631_s18  }
 0xc35   : > { %p12_p4 = scmp.ge.s32.totalorder %s15_s18, 4  }
 0xc37   :  { %14 = sbr.rel (!%p12_p4) target bundleno = 1 (0x1), region = 79 }

</bundles_post_ra>
